<compile_context>
chip_gen: v5e
topology: v5e:2x2
jax: 0.10.0
libtpu: 0.0.40
codegen_flags: <defaults>
</compile_context>

<pallas_src>
import functools
import math

import jax
import jax.numpy as jnp
from jax import lax
from jax.experimental import pallas as pl
from jax.experimental.pallas import tpu as pltpu

HIDDEN = 32        # hidden_channels
FILTER = 64        # filter_channels
N_HEADS = 2
N_LAYERS = 2
KERNEL_SIZE = 1    # TODO(synk): FFN Conv1d with kernel_size > 1 (same/causal padding) not implemented in-kernel
WINDOW = 4         # window_size
EPS = 1e-5


# ---------------------------------------------------------------------------
# Pallas kernel: all layers, one batch element per grid point.
# grid = (B, n_layers); the activation lives in VMEM scratch across layers.
# ---------------------------------------------------------------------------
def _encoder_kernel(x_ref, mcol_ref, mrow_ref, wa_ref, w2_ref, vec_ref, emb_ref,
                    o_ref, xs_ref, *, n_heads, window):
    layer = pl.program_id(1)
    n_layers = pl.num_programs(1)
    T, C = xs_ref.shape
    F = w2_ref.shape[1]
    K = C // n_heads
    R = 2 * window + 1
    scale = 1.0 / math.sqrt(K)

    mcol = mcol_ref[0]          # (T, 1)
    mrow = mrow_ref[0]          # (1, T)

    # First layer for this batch element: load x * mask into the resident
    # activation scratch (matches `x = x * x_mask` before the layer loop).
    @pl.when(layer == 0)
    def _init():
        xs_ref[...] = x_ref[0] * mcol

    x = xs_ref[...]             # (T, C) resident activation

    wa = wa_ref[0]              # (C, 4C + F)  = [Wq^T | Wk^T | Wv^T | Wo^T | W1^T]
    w2 = w2_ref[0]              # (F, C)       = W2^T
    vec = vec_ref[0]            # (4, 3C) packed vectors
    emb = emb_ref[0]            # (2, R, K)
    emb_k = emb[0]              # (R, K)
    emb_v = emb[1]              # (R, K)

    b_qkv = vec[0:1, :]                   # (1, 3C)
    b_o = vec[1:2, 0:C]                   # (1, C)
    b_f1 = vec[1:2, C:C + F]              # (1, F)
    b_f2 = vec[2:3, 0:C]                  # (1, C)
    g1 = vec[2:3, C:2 * C]
    be1 = vec[2:3, 2 * C:3 * C]
    g2 = vec[3:4, 0:C]
    be2 = vec[3:4, C:2 * C]

    def mm(a, b):        # (M, Kc) @ (Kc, N)
        return lax.dot_general(a, b, (((1,), (0,)), ((), ())),
                               preferred_element_type=jnp.float32)

    def mm_t(a, b):      # contract last dim with last dim (no transposes)
        return lax.dot_general(a, b, (((1,), (1,)), ((), ())),
                               preferred_element_type=jnp.float32)

    def layer_norm(v, g, b):
        mu = jnp.mean(v, axis=-1, keepdims=True)
        var = jnp.mean((v - mu) ** 2, axis=-1, keepdims=True)
        return (v - mu) * lax.rsqrt(var + EPS) * g + b

    # Additive attention mask (exp underflows to exactly 0 at masked columns,
    # equivalent to masked_fill(mask == 0, -1e4) after the final output mask).
    neg_mask = (1.0 - mcol * mrow) * (-1e4)              # (T, T)

    rows = lax.broadcasted_iota(jnp.int32, (T, T), 0)
    cols = lax.broadcasted_iota(jnp.int32, (T, T), 1)
    rel = cols - rows                                    # rel[i, j] = j - i

    # Fused QKV projection (Conv1d kernel-size 1 == matmul).
    qkv = mm(x, wa[:, 0:3 * C]) + b_qkv                  # (T, 3C)

    ctx_heads = []
    for h in range(n_heads):
        qh = qkv[:, h * K:(h + 1) * K] * scale                   # (T, K)
        kh = qkv[:, C + h * K:C + (h + 1) * K]                   # (T, K)
        vh = qkv[:, 2 * C + h * K:2 * C + (h + 1) * K]           # (T, K)

        scores = mm_t(qh, kh) + neg_mask                         # (T, T)

        # relative-key bias: scores[i, j] += qh[i] . emb_k[(j - i) + W]
        rl = mm_t(qh, emb_k)                                     # (T, R)
        for r in range(R):
            scores = scores + jnp.where(rel == (r - window), rl[:, r:r + 1], 0.0)

        smax = jnp.max(scores, axis=-1, keepdims=True)
        e = jnp.exp(scores - smax)
        p = e * pl.reciprocal(jnp.sum(e, axis=-1, keepdims=True), approx=True)

        ctx = mm(p, vh)                                          # (T, K)
        # relative-value term: ctx[i] += sum_d p[i, i + d] * emb_v[d + W]
        for r in range(R):
            w_r = jnp.sum(jnp.where(rel == (r - window), p, 0.0),
                          axis=-1, keepdims=True)                # (T, 1)
            ctx = ctx + w_r * emb_v[r:r + 1, :]
        ctx_heads.append(ctx)

    ctx_all = jnp.concatenate(ctx_heads, axis=-1)                # (T, C)
    attn_out = mm(ctx_all, wa[:, 3 * C:4 * C]) + b_o

    # residual + LayerNorm 1
    y = layer_norm(x + attn_out, g1, be1)

    # FFN (kernel_size == 1 Conv1d == matmul), relu activation
    h1 = jnp.maximum(mm(y * mcol, wa[:, 4 * C:4 * C + F]) + b_f1, 0.0)
    ffn = (mm(h1 * mcol, w2) + b_f2) * mcol

    # residual + LayerNorm 2
    z = layer_norm(y + ffn, g2, be2)

    xs_ref[...] = z

    @pl.when(layer == n_layers - 1)
    def _finalize():
        o_ref[0, :, :] = (z * mcol).astype(o_ref.dtype)          # final x * x_mask


# ---------------------------------------------------------------------------
# Wrapper / parameter packing
# ---------------------------------------------------------------------------
def _pack_params(params_list):
    # Big weight slab per layer: (C, 4C + F) = [Wq^T | Wk^T | Wv^T | Wo^T | W1^T]
    wa = jnp.stack([jnp.concatenate(
        [p['wq'].T, p['wk'].T, p['wv'].T, p['wo'].T, p['w1'].T], axis=1)
        for p in params_list])                                      # (L, C, 4C+F)
    w2 = jnp.stack([p['w2'].T for p in params_list])                # (L, F, C)

    def vec_rows(p):
        c = p['wq'].shape[0]
        r0 = jnp.concatenate([p['bq'], p['bk'], p['bv']])                       # (3C,)
        r1 = jnp.concatenate([p['bo'], p['bf1']])                               # (3C,)
        r2 = jnp.concatenate([p['bf2'], p['g1'], p['be1']])                     # (3C,)
        r3 = jnp.concatenate([p['g2'], p['be2'], jnp.zeros((c,), jnp.float32)]) # (3C,)
        return jnp.stack([r0, r1, r2, r3])                                      # (4, 3C)

    vecs = jnp.stack([vec_rows(p) for p in params_list])            # (L, 4, 3C)
    emb = jnp.stack([jnp.stack([p['emb_rel_k'][0], p['emb_rel_v'][0]])
                     for p in params_list])                         # (L, 2, 2W+1, K)
    return wa, w2, vecs, emb


def encoder_forward(x_bct, x_mask_b1t, params_list):
    # x_bct: (B, C, T) PyTorch layout; x_mask: (B, 1, T)
    x = jnp.transpose(x_bct, (0, 2, 1)).astype(jnp.float32)          # (B, T, C)
    mcol = jnp.transpose(x_mask_b1t, (0, 2, 1)).astype(jnp.float32)  # (B, T, 1)
    mrow = x_mask_b1t.astype(jnp.float32)                            # (B, 1, T)
    B, T, C = x.shape
    L = len(params_list)
    wa, w2, vecs, emb = _pack_params(params_list)
    F = w2.shape[1]
    R = emb.shape[2]
    K = emb.shape[3]

    kernel = functools.partial(_encoder_kernel, n_heads=N_HEADS, window=WINDOW)
    out = pl.pallas_call(
        kernel,
        out_shape=jax.ShapeDtypeStruct((B, T, C), jnp.float32),
        grid=(B, L),
        in_specs=[
            pl.BlockSpec((1, T, C), lambda b, l: (b, 0, 0)),           # x (layer 0 only)
            pl.BlockSpec((1, T, 1), lambda b, l: (b, 0, 0)),           # mask column
            pl.BlockSpec((1, 1, T), lambda b, l: (b, 0, 0)),           # mask row
            pl.BlockSpec((1, C, 4 * C + F), lambda b, l: (l, 0, 0)),   # packed weights
            pl.BlockSpec((1, F, C), lambda b, l: (l, 0, 0)),           # W2^T
            pl.BlockSpec((1, 4, 3 * C), lambda b, l: (l, 0, 0)),       # packed vectors
            pl.BlockSpec((1, 2, R, K), lambda b, l: (l, 0, 0, 0)),     # rel embeddings
        ],
        out_specs=pl.BlockSpec((1, T, C), lambda b, l: (b, 0, 0)),
        scratch_shapes=[pltpu.VMEM((T, C), jnp.float32)],              # resident activation
        compiler_params=pltpu.CompilerParams(
            dimension_semantics=("parallel", "arbitrary")),
    )(x, mcol, mrow, wa, w2, vecs, emb)
    return jnp.transpose(out, (0, 2, 1))                               # back to (B, C, T)


# ---------------------------------------------------------------------------
# Deterministic parameter initialization (shapes match the nn.Module)
# ---------------------------------------------------------------------------
def init_params(key, n_layers):
    kch = HIDDEN // N_HEADS
    params = []
    for l in range(n_layers):
        ks = jax.random.split(jax.random.fold_in(key, l), 16)

        def u(k, shape, lim):
            return jax.random.uniform(k, shape, jnp.float32, -lim, lim)

        xav = math.sqrt(6.0 / (HIDDEN + HIDDEN))
        p = dict(
            wq=u(ks[0], (HIDDEN, HIDDEN), xav),
            wk=u(ks[1], (HIDDEN, HIDDEN), xav),
            wv=u(ks[2], (HIDDEN, HIDDEN), xav),
            wo=u(ks[3], (HIDDEN, HIDDEN), xav),
            bq=u(ks[4], (HIDDEN,), 0.1),
            bk=u(ks[5], (HIDDEN,), 0.1),
            bv=u(ks[6], (HIDDEN,), 0.1),
            bo=u(ks[7], (HIDDEN,), 0.1),
            emb_rel_k=jax.random.normal(ks[8], (1, 2 * WINDOW + 1, kch), jnp.float32) * kch ** -0.5,
            emb_rel_v=jax.random.normal(ks[9], (1, 2 * WINDOW + 1, kch), jnp.float32) * kch ** -0.5,
            g1=jnp.ones((HIDDEN,), jnp.float32),
            be1=jnp.zeros((HIDDEN,), jnp.float32),
            w1=u(ks[10], (FILTER, HIDDEN), math.sqrt(1.0 / HIDDEN)),
            bf1=u(ks[11], (FILTER,), math.sqrt(1.0 / HIDDEN)),
            w2=u(ks[12], (HIDDEN, FILTER), math.sqrt(1.0 / FILTER)),
            bf2=u(ks[13], (HIDDEN,), math.sqrt(1.0 / FILTER)),
            g2=jnp.ones((HIDDEN,), jnp.float32),
            be2=jnp.zeros((HIDDEN,), jnp.float32),
        )
        params.append(p)
    return params


# ---------------------------------------------------------------------------
# Pure-JAX reference (same math, vectorized) for sanity checking
# ---------------------------------------------------------------------------
def build_rel_matrix(emb, T, window):
    # emb: (1, 2*window+1, K); R[i, j] = emb[0, (j - i) + W] if |j - i| <= W else 0
    rel = jnp.arange(T)[None, :] - jnp.arange(T)[:, None]
    valid = (jnp.abs(rel) <= window).astype(emb.dtype)
    idx = jnp.clip(rel + window, 0, 2 * window)
    return emb[0][idx] * valid[:, :, None]


def _layer_norm(x, g, b):
    mu = jnp.mean(x, axis=-1, keepdims=True)
    var = jnp.mean((x - mu) ** 2, axis=-1, keepdims=True)
    return (x - mu) * lax.rsqrt(var + EPS) * g + b


def reference_forward(x_bct, x_mask, params_list):
    x = jnp.transpose(x_bct, (0, 2, 1))
    mcol = jnp.transpose(x_mask, (0, 2, 1))
    mrow = x_mask
    B, T, C = x.shape
    K = C // N_HEADS
    x = x * mcol
    for p in params_list:
        rk = build_rel_matrix(p['emb_rel_k'], T, WINDOW)
        rv = build_rel_matrix(p['emb_rel_v'], T, WINDOW)
        q = x @ p['wq'].T + p['bq']
        k = x @ p['wk'].T + p['bk']
        v = x @ p['wv'].T + p['bv']
        q = q.reshape(B, T, N_HEADS, K).transpose(0, 2, 1, 3) / math.sqrt(K)
        k = k.reshape(B, T, N_HEADS, K).transpose(0, 2, 1, 3)
        v = v.reshape(B, T, N_HEADS, K).transpose(0, 2, 1, 3)
        scores = jnp.einsum('bhik,bhjk->bhij', q, k)
        scores = scores + jnp.einsum('bhik,ijk->bhij', q, rk)
        am = (mcol * mrow)[:, None, :, :]
        scores = jnp.where(am == 0.0, -1e4, scores)
        pa = jax.nn.softmax(scores, axis=-1)
        out = jnp.einsum('bhij,bhjk->bhik', pa, v)
        out = out + jnp.einsum('bhij,ijk->bhik', pa, rv)
        out = out.transpose(0, 2, 1, 3).reshape(B, T, C)
        y = out @ p['wo'].T + p['bo']
        x = _layer_norm(x + y, p['g1'], p['be1'])
        h1 = jnp.maximum((x * mcol) @ p['w1'].T + p['bf1'], 0.0)
        ffn = ((h1 * mcol) @ p['w2'].T + p['bf2']) * mcol
        x = _layer_norm(x + ffn, p['g2'], p['be2'])
    x = x * mcol
    return jnp.transpose(x, (0, 2, 1))


if __name__ == "__main__":
    key = jax.random.PRNGKey(0)
    B, T = 2, 16
    kx, kp = jax.random.split(key)
    x = jax.random.normal(kx, (B, HIDDEN, T), jnp.float32)          # PyTorch layout (B, C, T)
    lengths = jnp.array([16, 12])
    x_mask = (jnp.arange(T)[None, :] < lengths[:, None]).astype(jnp.float32)[:, None, :]  # (B, 1, T)

    params = init_params(kp, N_LAYERS)

    out = encoder_forward(x, x_mask, params)
    out = jax.block_until_ready(out)

    assert out.shape == (B, HIDDEN, T)
    assert bool(jnp.all(jnp.isfinite(out)))

    ref = reference_forward(x, x_mask, params)
    max_err = float(jnp.max(jnp.abs(out - ref)))
    assert max_err < 5e-2, f"mismatch vs reference: {max_err}"

    print("KERNEL_OK")
</pallas_src>

<mosaic_0001>
module attributes {stable_mosaic.version = 11 : i64} {
  func.func @_encoder_kernel(%arg0: i32, %arg1: i32, %arg2: memref<1x16x32xf32, #tpu.memory_space<vmem>>, %arg3: memref<1x16x1xf32, #tpu.memory_space<vmem>>, %arg4: memref<1x1x16xf32, #tpu.memory_space<vmem>>, %arg5: memref<1x32x192xf32, #tpu.memory_space<vmem>>, %arg6: memref<1x64x32xf32, #tpu.memory_space<vmem>>, %arg7: memref<1x4x96xf32, #tpu.memory_space<vmem>>, %arg8: memref<1x2x9x16xf32, #tpu.memory_space<vmem>>, %arg9: memref<1x16x32xf32, #tpu.memory_space<vmem>>, %arg10: memref<16x32xf32, #tpu.memory_space<vmem>>) attributes {dimension_semantics = [#tpu.dimension_semantics<parallel>, #tpu.dimension_semantics<arbitrary>], iteration_bounds = array<i64: 2, 2>, scalar_prefetch = 0 : i64, scratch_operands = 1 : i64, tpu.core_type = #tpu.core_type<tc>, window_params = [{transform_indices = @transform_0, window_bounds = array<i64: 1, 16, 32>}, {transform_indices = @transform_1, window_bounds = array<i64: 1, 16, 1>}, {transform_indices = @transform_2, window_bounds = array<i64: 1, 1, 16>}, {transform_indices = @transform_3, window_bounds = array<i64: 1, 32, 192>}, {transform_indices = @transform_4, window_bounds = array<i64: 1, 64, 32>}, {transform_indices = @transform_5, window_bounds = array<i64: 1, 4, 96>}, {transform_indices = @transform_6, window_bounds = array<i64: 1, 2, 9, 16>}, {transform_indices = @transform_7, window_bounds = array<i64: 1, 16, 32>}]} {
    %c0 = arith.constant 0 : index
    %c0_0 = arith.constant 0 : index
    %c0_1 = arith.constant 0 : index
    %0 = vector.load %arg3[%c0, %c0_0, %c0_1] : memref<1x16x1xf32, #tpu.memory_space<vmem>>, vector<1x16x1xf32>
    %1 = vector.shape_cast %0 : vector<1x16x1xf32> to vector<16x1xf32>
    %c0_2 = arith.constant 0 : index
    %c0_3 = arith.constant 0 : index
    %c0_4 = arith.constant 0 : index
    %2 = vector.load %arg4[%c0_2, %c0_3, %c0_4] : memref<1x1x16xf32, #tpu.memory_space<vmem>>, vector<1x1x16xf32>
    %3 = vector.shape_cast %2 : vector<1x1x16xf32> to vector<1x16xf32>
    %c0_i32 = arith.constant 0 : i32
    %4 = arith.cmpi eq, %arg1, %c0_i32 : i32
    %5 = arith.extui %4 : i1 to i32
    %c0_i32_5 = arith.constant 0 : i32
    %6 = arith.cmpi ne, %5, %c0_i32_5 : i32
    scf.if %6 {
      %c0_135 = arith.constant 0 : index
      %c0_136 = arith.constant 0 : index
      %c0_137 = arith.constant 0 : index
      %492 = vector.load %arg2[%c0_135, %c0_136, %c0_137] : memref<1x16x32xf32, #tpu.memory_space<vmem>>, vector<1x16x32xf32>
      %493 = vector.shape_cast %492 : vector<1x16x32xf32> to vector<16x32xf32>
      %494 = vector.broadcast %1 : vector<16x1xf32> to vector<16x32xf32>
      %495 = arith.mulf %493, %494 : vector<16x32xf32>
      %c0_138 = arith.constant 0 : index
      %c0_139 = arith.constant 0 : index
      %496 = vector.load %arg10[%c0_138, %c0_139] : memref<16x32xf32, #tpu.memory_space<vmem>>, vector<16x32xf32>
      tpu.vector_store %arg10[%c0_138, %c0_139], %495 {strides = array<i32>} : memref<16x32xf32, #tpu.memory_space<vmem>>, vector<16x32xf32>,
    } else {
    }
    %c0_6 = arith.constant 0 : index
    %c0_7 = arith.constant 0 : index
    %7 = vector.load %arg10[%c0_6, %c0_7] : memref<16x32xf32, #tpu.memory_space<vmem>>, vector<16x32xf32>
    %c0_8 = arith.constant 0 : index
    %c0_9 = arith.constant 0 : index
    %c0_10 = arith.constant 0 : index
    %8 = vector.load %arg5[%c0_8, %c0_9, %c0_10] : memref<1x32x192xf32, #tpu.memory_space<vmem>>, vector<1x32x192xf32>
    %9 = vector.shape_cast %8 : vector<1x32x192xf32> to vector<32x192xf32>
    %c0_11 = arith.constant 0 : index
    %c0_12 = arith.constant 0 : index
    %c0_13 = arith.constant 0 : index
    %10 = vector.load %arg6[%c0_11, %c0_12, %c0_13] : memref<1x64x32xf32, #tpu.memory_space<vmem>>, vector<1x64x32xf32>
    %11 = vector.shape_cast %10 : vector<1x64x32xf32> to vector<64x32xf32>
    %c0_14 = arith.constant 0 : index
    %c0_15 = arith.constant 0 : index
    %c0_16 = arith.constant 0 : index
    %12 = vector.load %arg7[%c0_14, %c0_15, %c0_16] : memref<1x4x96xf32, #tpu.memory_space<vmem>>, vector<1x4x96xf32>
    %13 = vector.shape_cast %12 : vector<1x4x96xf32> to vector<4x96xf32>
    %c0_17 = arith.constant 0 : index
    %c0_18 = arith.constant 0 : index
    %c0_19 = arith.constant 0 : index
    %c0_20 = arith.constant 0 : index
    %14 = vector.load %arg8[%c0_17, %c0_18, %c0_19, %c0_20] : memref<1x2x9x16xf32, #tpu.memory_space<vmem>>, vector<1x2x9x16xf32>
    %15 = vector.shape_cast %14 : vector<1x2x9x16xf32> to vector<2x9x16xf32>
    %16 = vector.extract_strided_slice %15 {offsets = [0, 0, 0], sizes = [1, 9, 16], strides = [1, 1, 1]} : vector<2x9x16xf32> to vector<1x9x16xf32>
    %17 = vector.shape_cast %16 : vector<1x9x16xf32> to vector<9x16xf32>
    %18 = vector.extract_strided_slice %15 {offsets = [1, 0, 0], sizes = [1, 9, 16], strides = [1, 1, 1]} : vector<2x9x16xf32> to vector<1x9x16xf32>
    %19 = vector.shape_cast %18 : vector<1x9x16xf32> to vector<9x16xf32>
    %20 = vector.extract_strided_slice %13 {offsets = [0, 0], sizes = [1, 96], strides = [1, 1]} : vector<4x96xf32> to vector<1x96xf32>
    %21 = vector.extract_strided_slice %13 {offsets = [1, 0], sizes = [1, 32], strides = [1, 1]} : vector<4x96xf32> to vector<1x32xf32>
    %22 = vector.extract_strided_slice %13 {offsets = [1, 32], sizes = [1, 64], strides = [1, 1]} : vector<4x96xf32> to vector<1x64xf32>
    %23 = vector.extract_strided_slice %13 {offsets = [2, 0], sizes = [1, 32], strides = [1, 1]} : vector<4x96xf32> to vector<1x32xf32>
    %24 = vector.extract_strided_slice %13 {offsets = [2, 32], sizes = [1, 32], strides = [1, 1]} : vector<4x96xf32> to vector<1x32xf32>
    %25 = vector.extract_strided_slice %13 {offsets = [2, 64], sizes = [1, 32], strides = [1, 1]} : vector<4x96xf32> to vector<1x32xf32>
    %26 = vector.extract_strided_slice %13 {offsets = [3, 0], sizes = [1, 32], strides = [1, 1]} : vector<4x96xf32> to vector<1x32xf32>
    %27 = vector.extract_strided_slice %13 {offsets = [3, 32], sizes = [1, 32], strides = [1, 1]} : vector<4x96xf32> to vector<1x32xf32>
    %28 = vector.broadcast %1 : vector<16x1xf32> to vector<16x16xf32>
    %29 = vector.broadcast %3 : vector<1x16xf32> to vector<16x16xf32>
    %30 = arith.mulf %28, %29 : vector<16x16xf32>
    %cst = arith.constant 1.000000e+00 : f32
    %31 = vector.broadcast %cst : f32 to vector<16x16xf32>
    %32 = arith.subf %31, %30 : vector<16x16xf32>
    %cst_21 = arith.constant -1.000000e+04 : f32
    %33 = vector.broadcast %cst_21 : f32 to vector<16x16xf32>
    %34 = arith.mulf %32, %33 : vector<16x16xf32>
    %35 = tpu.iota {dimensions = array<i32: 0>} : vector<16x16xi32>
    %36 = tpu.iota {dimensions = array<i32: 1>} : vector<16x16xi32>
    %37 = arith.subi %36, %35 : vector<16x16xi32>
    %38 = vector.extract_strided_slice %9 {offsets = [0, 0], sizes = [32, 96], strides = [1, 1]} : vector<32x192xf32> to vector<32x96xf32>
    %cst_22 = arith.constant dense<0.000000e+00> : vector<16x96xf32>
    %39 = tpu.matmul %7, %38, %cst_22 {dimension_numbers = #tpu.dot_dimension_numbers<[1], [0], [0], [1], [0, 0, 1, 1], [], []>} : vector<16x32xf32>, vector<32x96xf32>, vector<16x96xf32> -> vector<16x96xf32>
    %40 = vector.broadcast %20 : vector<1x96xf32> to vector<16x96xf32>
    %41 = arith.addf %39, %40 : vector<16x96xf32>
    %42 = vector.extract_strided_slice %41 {offsets = [0, 0], sizes = [16, 16], strides = [1, 1]} : vector<16x96xf32> to vector<16x16xf32>
    %cst_23 = arith.constant 2.500000e-01 : f32
    %43 = vector.broadcast %cst_23 : f32 to vector<16x16xf32>
    %44 = arith.mulf %42, %43 : vector<16x16xf32>
    %45 = vector.extract_strided_slice %41 {offsets = [0, 32], sizes = [16, 16], strides = [1, 1]} : vector<16x96xf32> to vector<16x16xf32>
    %46 = vector.extract_strided_slice %41 {offsets = [0, 64], sizes = [16, 16], strides = [1, 1]} : vector<16x96xf32> to vector<16x16xf32>
    %cst_24 = arith.constant dense<0.000000e+00> : vector<16x16xf32>
    %47 = tpu.matmul %44, %45, %cst_24 {dimension_numbers = #tpu.dot_dimension_numbers<[1], [1], [0], [0], [0, 0, 1, 0], [], []>} : vector<16x16xf32>, vector<16x16xf32>, vector<16x16xf32> -> vector<16x16xf32>
    %48 = arith.addf %47, %34 : vector<16x16xf32>
    %cst_25 = arith.constant dense<0.000000e+00> : vector<16x9xf32>
    %49 = tpu.matmul %44, %17, %cst_25 {dimension_numbers = #tpu.dot_dimension_numbers<[1], [1], [0], [0], [0, 0, 1, 0], [], []>} : vector<16x16xf32>, vector<9x16xf32>, vector<16x9xf32> -> vector<16x9xf32>
    %c-4_i32 = arith.constant -4 : i32
    %50 = vector.broadcast %c-4_i32 : i32 to vector<16x16xi32>
    %51 = arith.cmpi eq, %37, %50 : vector<16x16xi32>
    %52 = vector.extract_strided_slice %49 {offsets = [0, 0], sizes = [16, 1], strides = [1, 1]} : vector<16x9xf32> to vector<16x1xf32>
    %cst_26 = arith.constant 0.000000e+00 : f32
    %53 = vector.shape_cast %52 : vector<16x1xf32> to vector<16x1xf32>
    %54 = vector.broadcast %53 : vector<16x1xf32> to vector<16x16xf32>
    %55 = vector.broadcast %cst_26 : f32 to vector<16x16xf32>
    %56 = arith.select %51, %54, %55 : vector<16x16xi1>, vector<16x16xf32>
    %57 = arith.addf %48, %56 : vector<16x16xf32>
    %c-3_i32 = arith.constant -3 : i32
    %58 = vector.broadcast %c-3_i32 : i32 to vector<16x16xi32>
    %59 = arith.cmpi eq, %37, %58 : vector<16x16xi32>
    %60 = vector.extract_strided_slice %49 {offsets = [0, 1], sizes = [16, 1], strides = [1, 1]} : vector<16x9xf32> to vector<16x1xf32>
    %cst_27 = arith.constant 0.000000e+00 : f32
    %61 = vector.shape_cast %60 : vector<16x1xf32> to vector<16x1xf32>
    %62 = vector.broadcast %61 : vector<16x1xf32> to vector<16x16xf32>
    %63 = vector.broadcast %cst_27 : f32 to vector<16x16xf32>
    %64 = arith.select %59, %62, %63 : vector<16x16xi1>, vector<16x16xf32>
    %65 = arith.addf %57, %64 : vector<16x16xf32>
    %c-2_i32 = arith.constant -2 : i32
    %66 = vector.broadcast %c-2_i32 : i32 to vector<16x16xi32>
    %67 = arith.cmpi eq, %37, %66 : vector<16x16xi32>
    %68 = vector.extract_strided_slice %49 {offsets = [0, 2], sizes = [16, 1], strides = [1, 1]} : vector<16x9xf32> to vector<16x1xf32>
    %cst_28 = arith.constant 0.000000e+00 : f32
    %69 = vector.shape_cast %68 : vector<16x1xf32> to vector<16x1xf32>
    %70 = vector.broadcast %69 : vector<16x1xf32> to vector<16x16xf32>
    %71 = vector.broadcast %cst_28 : f32 to vector<16x16xf32>
    %72 = arith.select %67, %70, %71 : vector<16x16xi1>, vector<16x16xf32>
    %73 = arith.addf %65, %72 : vector<16x16xf32>
    %c-1_i32 = arith.constant -1 : i32
    %74 = vector.broadcast %c-1_i32 : i32 to vector<16x16xi32>
    %75 = arith.cmpi eq, %37, %74 : vector<16x16xi32>
    %76 = vector.extract_strided_slice %49 {offsets = [0, 3], sizes = [16, 1], strides = [1, 1]} : vector<16x9xf32> to vector<16x1xf32>
    %cst_29 = arith.constant 0.000000e+00 : f32
    %77 = vector.shape_cast %76 : vector<16x1xf32> to vector<16x1xf32>
    %78 = vector.broadcast %77 : vector<16x1xf32> to vector<16x16xf32>
    %79 = vector.broadcast %cst_29 : f32 to vector<16x16xf32>
    %80 = arith.select %75, %78, %79 : vector<16x16xi1>, vector<16x16xf32>
    %81 = arith.addf %73, %80 : vector<16x16xf32>
    %c0_i32_30 = arith.constant 0 : i32
    %82 = vector.broadcast %c0_i32_30 : i32 to vector<16x16xi32>
    %83 = arith.cmpi eq, %37, %82 : vector<16x16xi32>
    %84 = vector.extract_strided_slice %49 {offsets = [0, 4], sizes = [16, 1], strides = [1, 1]} : vector<16x9xf32> to vector<16x1xf32>
    %cst_31 = arith.constant 0.000000e+00 : f32
    %85 = vector.shape_cast %84 : vector<16x1xf32> to vector<16x1xf32>
    %86 = vector.broadcast %85 : vector<16x1xf32> to vector<16x16xf32>
    %87 = vector.broadcast %cst_31 : f32 to vector<16x16xf32>
    %88 = arith.select %83, %86, %87 : vector<16x16xi1>, vector<16x16xf32>
    %89 = arith.addf %81, %88 : vector<16x16xf32>
    %c1_i32 = arith.constant 1 : i32
    %90 = vector.broadcast %c1_i32 : i32 to vector<16x16xi32>
    %91 = arith.cmpi eq, %37, %90 : vector<16x16xi32>
    %92 = vector.extract_strided_slice %49 {offsets = [0, 5], sizes = [16, 1], strides = [1, 1]} : vector<16x9xf32> to vector<16x1xf32>
    %cst_32 = arith.constant 0.000000e+00 : f32
    %93 = vector.shape_cast %92 : vector<16x1xf32> to vector<16x1xf32>
    %94 = vector.broadcast %93 : vector<16x1xf32> to vector<16x16xf32>
    %95 = vector.broadcast %cst_32 : f32 to vector<16x16xf32>
    %96 = arith.select %91, %94, %95 : vector<16x16xi1>, vector<16x16xf32>
    %97 = arith.addf %89, %96 : vector<16x16xf32>
    %c2_i32 = arith.constant 2 : i32
    %98 = vector.broadcast %c2_i32 : i32 to vector<16x16xi32>
    %99 = arith.cmpi eq, %37, %98 : vector<16x16xi32>
    %100 = vector.extract_strided_slice %49 {offsets = [0, 6], sizes = [16, 1], strides = [1, 1]} : vector<16x9xf32> to vector<16x1xf32>
    %cst_33 = arith.constant 0.000000e+00 : f32
    %101 = vector.shape_cast %100 : vector<16x1xf32> to vector<16x1xf32>
    %102 = vector.broadcast %101 : vector<16x1xf32> to vector<16x16xf32>
    %103 = vector.broadcast %cst_33 : f32 to vector<16x16xf32>
    %104 = arith.select %99, %102, %103 : vector<16x16xi1>, vector<16x16xf32>
    %105 = arith.addf %97, %104 : vector<16x16xf32>
    %c3_i32 = arith.constant 3 : i32
    %106 = vector.broadcast %c3_i32 : i32 to vector<16x16xi32>
    %107 = arith.cmpi eq, %37, %106 : vector<16x16xi32>
    %108 = vector.extract_strided_slice %49 {offsets = [0, 7], sizes = [16, 1], strides = [1, 1]} : vector<16x9xf32> to vector<16x1xf32>
    %cst_34 = arith.constant 0.000000e+00 : f32
    %109 = vector.shape_cast %108 : vector<16x1xf32> to vector<16x1xf32>
    %110 = vector.broadcast %109 : vector<16x1xf32> to vector<16x16xf32>
    %111 = vector.broadcast %cst_34 : f32 to vector<16x16xf32>
    %112 = arith.select %107, %110, %111 : vector<16x16xi1>, vector<16x16xf32>
    %113 = arith.addf %105, %112 : vector<16x16xf32>
    %c4_i32 = arith.constant 4 : i32
    %114 = vector.broadcast %c4_i32 : i32 to vector<16x16xi32>
    %115 = arith.cmpi eq, %37, %114 : vector<16x16xi32>
    %116 = vector.extract_strided_slice %49 {offsets = [0, 8], sizes = [16, 1], strides = [1, 1]} : vector<16x9xf32> to vector<16x1xf32>
    %cst_35 = arith.constant 0.000000e+00 : f32
    %117 = vector.shape_cast %116 : vector<16x1xf32> to vector<16x1xf32>
    %118 = vector.broadcast %117 : vector<16x1xf32> to vector<16x16xf32>
    %119 = vector.broadcast %cst_35 : f32 to vector<16x16xf32>
    %120 = arith.select %115, %118, %119 : vector<16x16xi1>, vector<16x16xf32>
    %121 = arith.addf %113, %120 : vector<16x16xf32>
    %cst_36 = arith.constant dense<0xFF800000> : vector<16xf32>
    %122 = vector.multi_reduction <maximumf>, %121, %cst_36 [1] : vector<16x16xf32> to vector<16xf32>
    %123 = vector.shape_cast %122 : vector<16xf32> to vector<16x1xf32>
    %124 = vector.broadcast %123 : vector<16x1xf32> to vector<16x16xf32>
    %125 = arith.subf %121, %124 : vector<16x16xf32>
    %126 = math.exp %125 : vector<16x16xf32>
    %cst_37 = arith.constant dense<0.000000e+00> : vector<16xf32>
    %127 = vector.multi_reduction <add>, %126, %cst_37 [1] : vector<16x16xf32> to vector<16xf32>
    %128 = vector.shape_cast %127 : vector<16xf32> to vector<16x1xf32>
    %129 = tpu.reciprocal %128 {approx = true} : vector<16x1xf32> -> vector<16x1xf32>
    %130 = vector.broadcast %129 : vector<16x1xf32> to vector<16x16xf32>
    %131 = arith.mulf %126, %130 : vector<16x16xf32>
    %cst_38 = arith.constant dense<0.000000e+00> : vector<16x16xf32>
    %132 = tpu.matmul %131, %46, %cst_38 {dimension_numbers = #tpu.dot_dimension_numbers<[1], [0], [0], [1], [0, 0, 1, 1], [], []>} : vector<16x16xf32>, vector<16x16xf32>, vector<16x16xf32> -> vector<16x16xf32>
    %c-4_i32_39 = arith.constant -4 : i32
    %133 = vector.broadcast %c-4_i32_39 : i32 to vector<16x16xi32>
    %134 = arith.cmpi eq, %37, %133 : vector<16x16xi32>
    %cst_40 = arith.constant 0.000000e+00 : f32
    %135 = vector.broadcast %cst_40 : f32 to vector<16x16xf32>
    %136 = arith.select %134, %131, %135 : vector<16x16xi1>, vector<16x16xf32>
    %cst_41 = arith.constant dense<0.000000e+00> : vector<16xf32>
    %137 = vector.multi_reduction <add>, %136, %cst_41 [1] : vector<16x16xf32> to vector<16xf32>
    %138 = vector.shape_cast %137 : vector<16xf32> to vector<16x1xf32>
    %139 = vector.extract_strided_slice %19 {offsets = [0, 0], sizes = [1, 16], strides = [1, 1]} : vector<9x16xf32> to vector<1x16xf32>
    %140 = vector.broadcast %138 : vector<16x1xf32> to vector<16x16xf32>
    %141 = vector.broadcast %139 : vector<1x16xf32> to vector<16x16xf32>
    %142 = arith.mulf %140, %141 : vector<16x16xf32>
    %143 = arith.addf %132, %142 : vector<16x16xf32>
    %c-3_i32_42 = arith.constant -3 : i32
    %144 = vector.broadcast %c-3_i32_42 : i32 to vector<16x16xi32>
    %145 = arith.cmpi eq, %37, %144 : vector<16x16xi32>
    %cst_43 = arith.constant 0.000000e+00 : f32
    %146 = vector.broadcast %cst_43 : f32 to vector<16x16xf32>
    %147 = arith.select %145, %131, %146 : vector<16x16xi1>, vector<16x16xf32>
    %cst_44 = arith.constant dense<0.000000e+00> : vector<16xf32>
    %148 = vector.multi_reduction <add>, %147, %cst_44 [1] : vector<16x16xf32> to vector<16xf32>
    %149 = vector.shape_cast %148 : vector<16xf32> to vector<16x1xf32>
    %150 = vector.extract_strided_slice %19 {offsets = [1, 0], sizes = [1, 16], strides = [1, 1]} : vector<9x16xf32> to vector<1x16xf32>
    %151 = vector.broadcast %149 : vector<16x1xf32> to vector<16x16xf32>
    %152 = vector.broadcast %150 : vector<1x16xf32> to vector<16x16xf32>
    %153 = arith.mulf %151, %152 : vector<16x16xf32>
    %154 = arith.addf %143, %153 : vector<16x16xf32>
    %c-2_i32_45 = arith.constant -2 : i32
    %155 = vector.broadcast %c-2_i32_45 : i32 to vector<16x16xi32>
    %156 = arith.cmpi eq, %37, %155 : vector<16x16xi32>
    %cst_46 = arith.constant 0.000000e+00 : f32
    %157 = vector.broadcast %cst_46 : f32 to vector<16x16xf32>
    %158 = arith.select %156, %131, %157 : vector<16x16xi1>, vector<16x16xf32>
    %cst_47 = arith.constant dense<0.000000e+00> : vector<16xf32>
    %159 = vector.multi_reduction <add>, %158, %cst_47 [1] : vector<16x16xf32> to vector<16xf32>
    %160 = vector.shape_cast %159 : vector<16xf32> to vector<16x1xf32>
    %161 = vector.extract_strided_slice %19 {offsets = [2, 0], sizes = [1, 16], strides = [1, 1]} : vector<9x16xf32> to vector<1x16xf32>
    %162 = vector.broadcast %160 : vector<16x1xf32> to vector<16x16xf32>
    %163 = vector.broadcast %161 : vector<1x16xf32> to vector<16x16xf32>
    %164 = arith.mulf %162, %163 : vector<16x16xf32>
    %165 = arith.addf %154, %164 : vector<16x16xf32>
    %c-1_i32_48 = arith.constant -1 : i32
    %166 = vector.broadcast %c-1_i32_48 : i32 to vector<16x16xi32>
    %167 = arith.cmpi eq, %37, %166 : vector<16x16xi32>
    %cst_49 = arith.constant 0.000000e+00 : f32
    %168 = vector.broadcast %cst_49 : f32 to vector<16x16xf32>
    %169 = arith.select %167, %131, %168 : vector<16x16xi1>, vector<16x16xf32>
    %cst_50 = arith.constant dense<0.000000e+00> : vector<16xf32>
    %170 = vector.multi_reduction <add>, %169, %cst_50 [1] : vector<16x16xf32> to vector<16xf32>
    %171 = vector.shape_cast %170 : vector<16xf32> to vector<16x1xf32>
    %172 = vector.extract_strided_slice %19 {offsets = [3, 0], sizes = [1, 16], strides = [1, 1]} : vector<9x16xf32> to vector<1x16xf32>
    %173 = vector.broadcast %171 : vector<16x1xf32> to vector<16x16xf32>
    %174 = vector.broadcast %172 : vector<1x16xf32> to vector<16x16xf32>
    %175 = arith.mulf %173, %174 : vector<16x16xf32>
    %176 = arith.addf %165, %175 : vector<16x16xf32>
    %c0_i32_51 = arith.constant 0 : i32
    %177 = vector.broadcast %c0_i32_51 : i32 to vector<16x16xi32>
    %178 = arith.cmpi eq, %37, %177 : vector<16x16xi32>
    %cst_52 = arith.constant 0.000000e+00 : f32
    %179 = vector.broadcast %cst_52 : f32 to vector<16x16xf32>
    %180 = arith.select %178, %131, %179 : vector<16x16xi1>, vector<16x16xf32>
    %cst_53 = arith.constant dense<0.000000e+00> : vector<16xf32>
    %181 = vector.multi_reduction <add>, %180, %cst_53 [1] : vector<16x16xf32> to vector<16xf32>
    %182 = vector.shape_cast %181 : vector<16xf32> to vector<16x1xf32>
    %183 = vector.extract_strided_slice %19 {offsets = [4, 0], sizes = [1, 16], strides = [1, 1]} : vector<9x16xf32> to vector<1x16xf32>
    %184 = vector.broadcast %182 : vector<16x1xf32> to vector<16x16xf32>
    %185 = vector.broadcast %183 : vector<1x16xf32> to vector<16x16xf32>
    %186 = arith.mulf %184, %185 : vector<16x16xf32>
    %187 = arith.addf %176, %186 : vector<16x16xf32>
    %c1_i32_54 = arith.constant 1 : i32
    %188 = vector.broadcast %c1_i32_54 : i32 to vector<16x16xi32>
    %189 = arith.cmpi eq, %37, %188 : vector<16x16xi32>
    %cst_55 = arith.constant 0.000000e+00 : f32
    %190 = vector.broadcast %cst_55 : f32 to vector<16x16xf32>
    %191 = arith.select %189, %131, %190 : vector<16x16xi1>, vector<16x16xf32>
    %cst_56 = arith.constant dense<0.000000e+00> : vector<16xf32>
    %192 = vector.multi_reduction <add>, %191, %cst_56 [1] : vector<16x16xf32> to vector<16xf32>
    %193 = vector.shape_cast %192 : vector<16xf32> to vector<16x1xf32>
    %194 = vector.extract_strided_slice %19 {offsets = [5, 0], sizes = [1, 16], strides = [1, 1]} : vector<9x16xf32> to vector<1x16xf32>
    %195 = vector.broadcast %193 : vector<16x1xf32> to vector<16x16xf32>
    %196 = vector.broadcast %194 : vector<1x16xf32> to vector<16x16xf32>
    %197 = arith.mulf %195, %196 : vector<16x16xf32>
    %198 = arith.addf %187, %197 : vector<16x16xf32>
    %c2_i32_57 = arith.constant 2 : i32
    %199 = vector.broadcast %c2_i32_57 : i32 to vector<16x16xi32>
    %200 = arith.cmpi eq, %37, %199 : vector<16x16xi32>
    %cst_58 = arith.constant 0.000000e+00 : f32
    %201 = vector.broadcast %cst_58 : f32 to vector<16x16xf32>
    %202 = arith.select %200, %131, %201 : vector<16x16xi1>, vector<16x16xf32>
    %cst_59 = arith.constant dense<0.000000e+00> : vector<16xf32>
    %203 = vector.multi_reduction <add>, %202, %cst_59 [1] : vector<16x16xf32> to vector<16xf32>
    %204 = vector.shape_cast %203 : vector<16xf32> to vector<16x1xf32>
    %205 = vector.extract_strided_slice %19 {offsets = [6, 0], sizes = [1, 16], strides = [1, 1]} : vector<9x16xf32> to vector<1x16xf32>
    %206 = vector.broadcast %204 : vector<16x1xf32> to vector<16x16xf32>
    %207 = vector.broadcast %205 : vector<1x16xf32> to vector<16x16xf32>
    %208 = arith.mulf %206, %207 : vector<16x16xf32>
    %209 = arith.addf %198, %208 : vector<16x16xf32>
    %c3_i32_60 = arith.constant 3 : i32
    %210 = vector.broadcast %c3_i32_60 : i32 to vector<16x16xi32>
    %211 = arith.cmpi eq, %37, %210 : vector<16x16xi32>
    %cst_61 = arith.constant 0.000000e+00 : f32
    %212 = vector.broadcast %cst_61 : f32 to vector<16x16xf32>
    %213 = arith.select %211, %131, %212 : vector<16x16xi1>, vector<16x16xf32>
    %cst_62 = arith.constant dense<0.000000e+00> : vector<16xf32>
    %214 = vector.multi_reduction <add>, %213, %cst_62 [1] : vector<16x16xf32> to vector<16xf32>
    %215 = vector.shape_cast %214 : vector<16xf32> to vector<16x1xf32>
    %216 = vector.extract_strided_slice %19 {offsets = [7, 0], sizes = [1, 16], strides = [1, 1]} : vector<9x16xf32> to vector<1x16xf32>
    %217 = vector.broadcast %215 : vector<16x1xf32> to vector<16x16xf32>
    %218 = vector.broadcast %216 : vector<1x16xf32> to vector<16x16xf32>
    %219 = arith.mulf %217, %218 : vector<16x16xf32>
    %220 = arith.addf %209, %219 : vector<16x16xf32>
    %c4_i32_63 = arith.constant 4 : i32
    %221 = vector.broadcast %c4_i32_63 : i32 to vector<16x16xi32>
    %222 = arith.cmpi eq, %37, %221 : vector<16x16xi32>
    %cst_64 = arith.constant 0.000000e+00 : f32
    %223 = vector.broadcast %cst_64 : f32 to vector<16x16xf32>
    %224 = arith.select %222, %131, %223 : vector<16x16xi1>, vector<16x16xf32>
    %cst_65 = arith.constant dense<0.000000e+00> : vector<16xf32>
    %225 = vector.multi_reduction <add>, %224, %cst_65 [1] : vector<16x16xf32> to vector<16xf32>
    %226 = vector.shape_cast %225 : vector<16xf32> to vector<16x1xf32>
    %227 = vector.extract_strided_slice %19 {offsets = [8, 0], sizes = [1, 16], strides = [1, 1]} : vector<9x16xf32> to vector<1x16xf32>
    %228 = vector.broadcast %226 : vector<16x1xf32> to vector<16x16xf32>
    %229 = vector.broadcast %227 : vector<1x16xf32> to vector<16x16xf32>
    %230 = arith.mulf %228, %229 : vector<16x16xf32>
    %231 = arith.addf %220, %230 : vector<16x16xf32>
    %232 = vector.extract_strided_slice %41 {offsets = [0, 16], sizes = [16, 16], strides = [1, 1]} : vector<16x96xf32> to vector<16x16xf32>
    %cst_66 = arith.constant 2.500000e-01 : f32
    %233 = vector.broadcast %cst_66 : f32 to vector<16x16xf32>
    %234 = arith.mulf %232, %233 : vector<16x16xf32>
    %235 = vector.extract_strided_slice %41 {offsets = [0, 48], sizes = [16, 16], strides = [1, 1]} : vector<16x96xf32> to vector<16x16xf32>
    %236 = vector.extract_strided_slice %41 {offsets = [0, 80], sizes = [16, 16], strides = [1, 1]} : vector<16x96xf32> to vector<16x16xf32>
    %cst_67 = arith.constant dense<0.000000e+00> : vector<16x16xf32>
    %237 = tpu.matmul %234, %235, %cst_67 {dimension_numbers = #tpu.dot_dimension_numbers<[1], [1], [0], [0], [0, 0, 1, 0], [], []>} : vector<16x16xf32>, vector<16x16xf32>, vector<16x16xf32> -> vector<16x16xf32>
    %238 = arith.addf %237, %34 : vector<16x16xf32>
    %cst_68 = arith.constant dense<0.000000e+00> : vector<16x9xf32>
    %239 = tpu.matmul %234, %17, %cst_68 {dimension_numbers = #tpu.dot_dimension_numbers<[1], [1], [0], [0], [0, 0, 1, 0], [], []>} : vector<16x16xf32>, vector<9x16xf32>, vector<16x9xf32> -> vector<16x9xf32>
    %c-4_i32_69 = arith.constant -4 : i32
    %240 = vector.broadcast %c-4_i32_69 : i32 to vector<16x16xi32>
    %241 = arith.cmpi eq, %37, %240 : vector<16x16xi32>
    %242 = vector.extract_strided_slice %239 {offsets = [0, 0], sizes = [16, 1], strides = [1, 1]} : vector<16x9xf32> to vector<16x1xf32>
    %cst_70 = arith.constant 0.000000e+00 : f32
    %243 = vector.shape_cast %242 : vector<16x1xf32> to vector<16x1xf32>
    %244 = vector.broadcast %243 : vector<16x1xf32> to vector<16x16xf32>
    %245 = vector.broadcast %cst_70 : f32 to vector<16x16xf32>
    %246 = arith.select %241, %244, %245 : vector<16x16xi1>, vector<16x16xf32>
    %247 = arith.addf %238, %246 : vector<16x16xf32>
    %c-3_i32_71 = arith.constant -3 : i32
    %248 = vector.broadcast %c-3_i32_71 : i32 to vector<16x16xi32>
    %249 = arith.cmpi eq, %37, %248 : vector<16x16xi32>
    %250 = vector.extract_strided_slice %239 {offsets = [0, 1], sizes = [16, 1], strides = [1, 1]} : vector<16x9xf32> to vector<16x1xf32>
    %cst_72 = arith.constant 0.000000e+00 : f32
    %251 = vector.shape_cast %250 : vector<16x1xf32> to vector<16x1xf32>
    %252 = vector.broadcast %251 : vector<16x1xf32> to vector<16x16xf32>
    %253 = vector.broadcast %cst_72 : f32 to vector<16x16xf32>
    %254 = arith.select %249, %252, %253 : vector<16x16xi1>, vector<16x16xf32>
    %255 = arith.addf %247, %254 : vector<16x16xf32>
    %c-2_i32_73 = arith.constant -2 : i32
    %256 = vector.broadcast %c-2_i32_73 : i32 to vector<16x16xi32>
    %257 = arith.cmpi eq, %37, %256 : vector<16x16xi32>
    %258 = vector.extract_strided_slice %239 {offsets = [0, 2], sizes = [16, 1], strides = [1, 1]} : vector<16x9xf32> to vector<16x1xf32>
    %cst_74 = arith.constant 0.000000e+00 : f32
    %259 = vector.shape_cast %258 : vector<16x1xf32> to vector<16x1xf32>
    %260 = vector.broadcast %259 : vector<16x1xf32> to vector<16x16xf32>
    %261 = vector.broadcast %cst_74 : f32 to vector<16x16xf32>
    %262 = arith.select %257, %260, %261 : vector<16x16xi1>, vector<16x16xf32>
    %263 = arith.addf %255, %262 : vector<16x16xf32>
    %c-1_i32_75 = arith.constant -1 : i32
    %264 = vector.broadcast %c-1_i32_75 : i32 to vector<16x16xi32>
    %265 = arith.cmpi eq, %37, %264 : vector<16x16xi32>
    %266 = vector.extract_strided_slice %239 {offsets = [0, 3], sizes = [16, 1], strides = [1, 1]} : vector<16x9xf32> to vector<16x1xf32>
    %cst_76 = arith.constant 0.000000e+00 : f32
    %267 = vector.shape_cast %266 : vector<16x1xf32> to vector<16x1xf32>
    %268 = vector.broadcast %267 : vector<16x1xf32> to vector<16x16xf32>
    %269 = vector.broadcast %cst_76 : f32 to vector<16x16xf32>
    %270 = arith.select %265, %268, %269 : vector<16x16xi1>, vector<16x16xf32>
    %271 = arith.addf %263, %270 : vector<16x16xf32>
    %c0_i32_77 = arith.constant 0 : i32
    %272 = vector.broadcast %c0_i32_77 : i32 to vector<16x16xi32>
    %273 = arith.cmpi eq, %37, %272 : vector<16x16xi32>
    %274 = vector.extract_strided_slice %239 {offsets = [0, 4], sizes = [16, 1], strides = [1, 1]} : vector<16x9xf32> to vector<16x1xf32>
    %cst_78 = arith.constant 0.000000e+00 : f32
    %275 = vector.shape_cast %274 : vector<16x1xf32> to vector<16x1xf32>
    %276 = vector.broadcast %275 : vector<16x1xf32> to vector<16x16xf32>
    %277 = vector.broadcast %cst_78 : f32 to vector<16x16xf32>
    %278 = arith.select %273, %276, %277 : vector<16x16xi1>, vector<16x16xf32>
    %279 = arith.addf %271, %278 : vector<16x16xf32>
    %c1_i32_79 = arith.constant 1 : i32
    %280 = vector.broadcast %c1_i32_79 : i32 to vector<16x16xi32>
    %281 = arith.cmpi eq, %37, %280 : vector<16x16xi32>
    %282 = vector.extract_strided_slice %239 {offsets = [0, 5], sizes = [16, 1], strides = [1, 1]} : vector<16x9xf32> to vector<16x1xf32>
    %cst_80 = arith.constant 0.000000e+00 : f32
    %283 = vector.shape_cast %282 : vector<16x1xf32> to vector<16x1xf32>
    %284 = vector.broadcast %283 : vector<16x1xf32> to vector<16x16xf32>
    %285 = vector.broadcast %cst_80 : f32 to vector<16x16xf32>
    %286 = arith.select %281, %284, %285 : vector<16x16xi1>, vector<16x16xf32>
    %287 = arith.addf %279, %286 : vector<16x16xf32>
    %c2_i32_81 = arith.constant 2 : i32
    %288 = vector.broadcast %c2_i32_81 : i32 to vector<16x16xi32>
    %289 = arith.cmpi eq, %37, %288 : vector<16x16xi32>
    %290 = vector.extract_strided_slice %239 {offsets = [0, 6], sizes = [16, 1], strides = [1, 1]} : vector<16x9xf32> to vector<16x1xf32>
    %cst_82 = arith.constant 0.000000e+00 : f32
    %291 = vector.shape_cast %290 : vector<16x1xf32> to vector<16x1xf32>
    %292 = vector.broadcast %291 : vector<16x1xf32> to vector<16x16xf32>
    %293 = vector.broadcast %cst_82 : f32 to vector<16x16xf32>
    %294 = arith.select %289, %292, %293 : vector<16x16xi1>, vector<16x16xf32>
    %295 = arith.addf %287, %294 : vector<16x16xf32>
    %c3_i32_83 = arith.constant 3 : i32
    %296 = vector.broadcast %c3_i32_83 : i32 to vector<16x16xi32>
    %297 = arith.cmpi eq, %37, %296 : vector<16x16xi32>
    %298 = vector.extract_strided_slice %239 {offsets = [0, 7], sizes = [16, 1], strides = [1, 1]} : vector<16x9xf32> to vector<16x1xf32>
    %cst_84 = arith.constant 0.000000e+00 : f32
    %299 = vector.shape_cast %298 : vector<16x1xf32> to vector<16x1xf32>
    %300 = vector.broadcast %299 : vector<16x1xf32> to vector<16x16xf32>
    %301 = vector.broadcast %cst_84 : f32 to vector<16x16xf32>
    %302 = arith.select %297, %300, %301 : vector<16x16xi1>, vector<16x16xf32>
    %303 = arith.addf %295, %302 : vector<16x16xf32>
    %c4_i32_85 = arith.constant 4 : i32
    %304 = vector.broadcast %c4_i32_85 : i32 to vector<16x16xi32>
    %305 = arith.cmpi eq, %37, %304 : vector<16x16xi32>
    %306 = vector.extract_strided_slice %239 {offsets = [0, 8], sizes = [16, 1], strides = [1, 1]} : vector<16x9xf32> to vector<16x1xf32>
    %cst_86 = arith.constant 0.000000e+00 : f32
    %307 = vector.shape_cast %306 : vector<16x1xf32> to vector<16x1xf32>
    %308 = vector.broadcast %307 : vector<16x1xf32> to vector<16x16xf32>
    %309 = vector.broadcast %cst_86 : f32 to vector<16x16xf32>
    %310 = arith.select %305, %308, %309 : vector<16x16xi1>, vector<16x16xf32>
    %311 = arith.addf %303, %310 : vector<16x16xf32>
    %cst_87 = arith.constant dense<0xFF800000> : vector<16xf32>
    %312 = vector.multi_reduction <maximumf>, %311, %cst_87 [1] : vector<16x16xf32> to vector<16xf32>
    %313 = vector.shape_cast %312 : vector<16xf32> to vector<16x1xf32>
    %314 = vector.broadcast %313 : vector<16x1xf32> to vector<16x16xf32>
    %315 = arith.subf %311, %314 : vector<16x16xf32>
    %316 = math.exp %315 : vector<16x16xf32>
    %cst_88 = arith.constant dense<0.000000e+00> : vector<16xf32>
    %317 = vector.multi_reduction <add>, %316, %cst_88 [1] : vector<16x16xf32> to vector<16xf32>
    %318 = vector.shape_cast %317 : vector<16xf32> to vector<16x1xf32>
    %319 = tpu.reciprocal %318 {approx = true} : vector<16x1xf32> -> vector<16x1xf32>
    %320 = vector.broadcast %319 : vector<16x1xf32> to vector<16x16xf32>
    %321 = arith.mulf %316, %320 : vector<16x16xf32>
    %cst_89 = arith.constant dense<0.000000e+00> : vector<16x16xf32>
    %322 = tpu.matmul %321, %236, %cst_89 {dimension_numbers = #tpu.dot_dimension_numbers<[1], [0], [0], [1], [0, 0, 1, 1], [], []>} : vector<16x16xf32>, vector<16x16xf32>, vector<16x16xf32> -> vector<16x16xf32>
    %c-4_i32_90 = arith.constant -4 : i32
    %323 = vector.broadcast %c-4_i32_90 : i32 to vector<16x16xi32>
    %324 = arith.cmpi eq, %37, %323 : vector<16x16xi32>
    %cst_91 = arith.constant 0.000000e+00 : f32
    %325 = vector.broadcast %cst_91 : f32 to vector<16x16xf32>
    %326 = arith.select %324, %321, %325 : vector<16x16xi1>, vector<16x16xf32>
    %cst_92 = arith.constant dense<0.000000e+00> : vector<16xf32>
    %327 = vector.multi_reduction <add>, %326, %cst_92 [1] : vector<16x16xf32> to vector<16xf32>
    %328 = vector.shape_cast %327 : vector<16xf32> to vector<16x1xf32>
    %329 = vector.extract_strided_slice %19 {offsets = [0, 0], sizes = [1, 16], strides = [1, 1]} : vector<9x16xf32> to vector<1x16xf32>
    %330 = vector.broadcast %328 : vector<16x1xf32> to vector<16x16xf32>
    %331 = vector.broadcast %329 : vector<1x16xf32> to vector<16x16xf32>
    %332 = arith.mulf %330, %331 : vector<16x16xf32>
    %333 = arith.addf %322, %332 : vector<16x16xf32>
    %c-3_i32_93 = arith.constant -3 : i32
    %334 = vector.broadcast %c-3_i32_93 : i32 to vector<16x16xi32>
    %335 = arith.cmpi eq, %37, %334 : vector<16x16xi32>
    %cst_94 = arith.constant 0.000000e+00 : f32
    %336 = vector.broadcast %cst_94 : f32 to vector<16x16xf32>
    %337 = arith.select %335, %321, %336 : vector<16x16xi1>, vector<16x16xf32>
    %cst_95 = arith.constant dense<0.000000e+00> : vector<16xf32>
    %338 = vector.multi_reduction <add>, %337, %cst_95 [1] : vector<16x16xf32> to vector<16xf32>
    %339 = vector.shape_cast %338 : vector<16xf32> to vector<16x1xf32>
    %340 = vector.extract_strided_slice %19 {offsets = [1, 0], sizes = [1, 16], strides = [1, 1]} : vector<9x16xf32> to vector<1x16xf32>
    %341 = vector.broadcast %339 : vector<16x1xf32> to vector<16x16xf32>
    %342 = vector.broadcast %340 : vector<1x16xf32> to vector<16x16xf32>
    %343 = arith.mulf %341, %342 : vector<16x16xf32>
    %344 = arith.addf %333, %343 : vector<16x16xf32>
    %c-2_i32_96 = arith.constant -2 : i32
    %345 = vector.broadcast %c-2_i32_96 : i32 to vector<16x16xi32>
    %346 = arith.cmpi eq, %37, %345 : vector<16x16xi32>
    %cst_97 = arith.constant 0.000000e+00 : f32
    %347 = vector.broadcast %cst_97 : f32 to vector<16x16xf32>
    %348 = arith.select %346, %321, %347 : vector<16x16xi1>, vector<16x16xf32>
    %cst_98 = arith.constant dense<0.000000e+00> : vector<16xf32>
    %349 = vector.multi_reduction <add>, %348, %cst_98 [1] : vector<16x16xf32> to vector<16xf32>
    %350 = vector.shape_cast %349 : vector<16xf32> to vector<16x1xf32>
    %351 = vector.extract_strided_slice %19 {offsets = [2, 0], sizes = [1, 16], strides = [1, 1]} : vector<9x16xf32> to vector<1x16xf32>
    %352 = vector.broadcast %350 : vector<16x1xf32> to vector<16x16xf32>
    %353 = vector.broadcast %351 : vector<1x16xf32> to vector<16x16xf32>
    %354 = arith.mulf %352, %353 : vector<16x16xf32>
    %355 = arith.addf %344, %354 : vector<16x16xf32>
    %c-1_i32_99 = arith.constant -1 : i32
    %356 = vector.broadcast %c-1_i32_99 : i32 to vector<16x16xi32>
    %357 = arith.cmpi eq, %37, %356 : vector<16x16xi32>
    %cst_100 = arith.constant 0.000000e+00 : f32
    %358 = vector.broadcast %cst_100 : f32 to vector<16x16xf32>
    %359 = arith.select %357, %321, %358 : vector<16x16xi1>, vector<16x16xf32>
    %cst_101 = arith.constant dense<0.000000e+00> : vector<16xf32>
    %360 = vector.multi_reduction <add>, %359, %cst_101 [1] : vector<16x16xf32> to vector<16xf32>
    %361 = vector.shape_cast %360 : vector<16xf32> to vector<16x1xf32>
    %362 = vector.extract_strided_slice %19 {offsets = [3, 0], sizes = [1, 16], strides = [1, 1]} : vector<9x16xf32> to vector<1x16xf32>
    %363 = vector.broadcast %361 : vector<16x1xf32> to vector<16x16xf32>
    %364 = vector.broadcast %362 : vector<1x16xf32> to vector<16x16xf32>
    %365 = arith.mulf %363, %364 : vector<16x16xf32>
    %366 = arith.addf %355, %365 : vector<16x16xf32>
    %c0_i32_102 = arith.constant 0 : i32
    %367 = vector.broadcast %c0_i32_102 : i32 to vector<16x16xi32>
    %368 = arith.cmpi eq, %37, %367 : vector<16x16xi32>
    %cst_103 = arith.constant 0.000000e+00 : f32
    %369 = vector.broadcast %cst_103 : f32 to vector<16x16xf32>
    %370 = arith.select %368, %321, %369 : vector<16x16xi1>, vector<16x16xf32>
    %cst_104 = arith.constant dense<0.000000e+00> : vector<16xf32>
    %371 = vector.multi_reduction <add>, %370, %cst_104 [1] : vector<16x16xf32> to vector<16xf32>
    %372 = vector.shape_cast %371 : vector<16xf32> to vector<16x1xf32>
    %373 = vector.extract_strided_slice %19 {offsets = [4, 0], sizes = [1, 16], strides = [1, 1]} : vector<9x16xf32> to vector<1x16xf32>
    %374 = vector.broadcast %372 : vector<16x1xf32> to vector<16x16xf32>
    %375 = vector.broadcast %373 : vector<1x16xf32> to vector<16x16xf32>
    %376 = arith.mulf %374, %375 : vector<16x16xf32>
    %377 = arith.addf %366, %376 : vector<16x16xf32>
    %c1_i32_105 = arith.constant 1 : i32
    %378 = vector.broadcast %c1_i32_105 : i32 to vector<16x16xi32>
    %379 = arith.cmpi eq, %37, %378 : vector<16x16xi32>
    %cst_106 = arith.constant 0.000000e+00 : f32
    %380 = vector.broadcast %cst_106 : f32 to vector<16x16xf32>
    %381 = arith.select %379, %321, %380 : vector<16x16xi1>, vector<16x16xf32>
    %cst_107 = arith.constant dense<0.000000e+00> : vector<16xf32>
    %382 = vector.multi_reduction <add>, %381, %cst_107 [1] : vector<16x16xf32> to vector<16xf32>
    %383 = vector.shape_cast %382 : vector<16xf32> to vector<16x1xf32>
    %384 = vector.extract_strided_slice %19 {offsets = [5, 0], sizes = [1, 16], strides = [1, 1]} : vector<9x16xf32> to vector<1x16xf32>
    %385 = vector.broadcast %383 : vector<16x1xf32> to vector<16x16xf32>
    %386 = vector.broadcast %384 : vector<1x16xf32> to vector<16x16xf32>
    %387 = arith.mulf %385, %386 : vector<16x16xf32>
    %388 = arith.addf %377, %387 : vector<16x16xf32>
    %c2_i32_108 = arith.constant 2 : i32
    %389 = vector.broadcast %c2_i32_108 : i32 to vector<16x16xi32>
    %390 = arith.cmpi eq, %37, %389 : vector<16x16xi32>
    %cst_109 = arith.constant 0.000000e+00 : f32
    %391 = vector.broadcast %cst_109 : f32 to vector<16x16xf32>
    %392 = arith.select %390, %321, %391 : vector<16x16xi1>, vector<16x16xf32>
    %cst_110 = arith.constant dense<0.000000e+00> : vector<16xf32>
    %393 = vector.multi_reduction <add>, %392, %cst_110 [1] : vector<16x16xf32> to vector<16xf32>
    %394 = vector.shape_cast %393 : vector<16xf32> to vector<16x1xf32>
    %395 = vector.extract_strided_slice %19 {offsets = [6, 0], sizes = [1, 16], strides = [1, 1]} : vector<9x16xf32> to vector<1x16xf32>
    %396 = vector.broadcast %394 : vector<16x1xf32> to vector<16x16xf32>
    %397 = vector.broadcast %395 : vector<1x16xf32> to vector<16x16xf32>
    %398 = arith.mulf %396, %397 : vector<16x16xf32>
    %399 = arith.addf %388, %398 : vector<16x16xf32>
    %c3_i32_111 = arith.constant 3 : i32
    %400 = vector.broadcast %c3_i32_111 : i32 to vector<16x16xi32>
    %401 = arith.cmpi eq, %37, %400 : vector<16x16xi32>
    %cst_112 = arith.constant 0.000000e+00 : f32
    %402 = vector.broadcast %cst_112 : f32 to vector<16x16xf32>
    %403 = arith.select %401, %321, %402 : vector<16x16xi1>, vector<16x16xf32>
    %cst_113 = arith.constant dense<0.000000e+00> : vector<16xf32>
    %404 = vector.multi_reduction <add>, %403, %cst_113 [1] : vector<16x16xf32> to vector<16xf32>
    %405 = vector.shape_cast %404 : vector<16xf32> to vector<16x1xf32>
    %406 = vector.extract_strided_slice %19 {offsets = [7, 0], sizes = [1, 16], strides = [1, 1]} : vector<9x16xf32> to vector<1x16xf32>
    %407 = vector.broadcast %405 : vector<16x1xf32> to vector<16x16xf32>
    %408 = vector.broadcast %406 : vector<1x16xf32> to vector<16x16xf32>
    %409 = arith.mulf %407, %408 : vector<16x16xf32>
    %410 = arith.addf %399, %409 : vector<16x16xf32>
    %c4_i32_114 = arith.constant 4 : i32
    %411 = vector.broadcast %c4_i32_114 : i32 to vector<16x16xi32>
    %412 = arith.cmpi eq, %37, %411 : vector<16x16xi32>
    %cst_115 = arith.constant 0.000000e+00 : f32
    %413 = vector.broadcast %cst_115 : f32 to vector<16x16xf32>
    %414 = arith.select %412, %321, %413 : vector<16x16xi1>, vector<16x16xf32>
    %cst_116 = arith.constant dense<0.000000e+00> : vector<16xf32>
    %415 = vector.multi_reduction <add>, %414, %cst_116 [1] : vector<16x16xf32> to vector<16xf32>
    %416 = vector.shape_cast %415 : vector<16xf32> to vector<16x1xf32>
    %417 = vector.extract_strided_slice %19 {offsets = [8, 0], sizes = [1, 16], strides = [1, 1]} : vector<9x16xf32> to vector<1x16xf32>
    %418 = vector.broadcast %416 : vector<16x1xf32> to vector<16x16xf32>
    %419 = vector.broadcast %417 : vector<1x16xf32> to vector<16x16xf32>
    %420 = arith.mulf %418, %419 : vector<16x16xf32>
    %421 = arith.addf %410, %420 : vector<16x16xf32>
    %422 = tpu.concatenate %231, %421 in 1 : vector<16x16xf32>, vector<16x16xf32> -> vector<16x32xf32>
    %423 = vector.extract_strided_slice %9 {offsets = [0, 96], sizes = [32, 32], strides = [1, 1]} : vector<32x192xf32> to vector<32x32xf32>
    %cst_117 = arith.constant dense<0.000000e+00> : vector<16x32xf32>
    %424 = tpu.matmul %422, %423, %cst_117 {dimension_numbers = #tpu.dot_dimension_numbers<[1], [0], [0], [1], [0, 0, 1, 1], [], []>} : vector<16x32xf32>, vector<32x32xf32>, vector<16x32xf32> -> vector<16x32xf32>
    %425 = vector.broadcast %21 : vector<1x32xf32> to vector<16x32xf32>
    %426 = arith.addf %424, %425 : vector<16x32xf32>
    %427 = arith.addf %7, %426 : vector<16x32xf32>
    %cst_118 = arith.constant dense<0.000000e+00> : vector<16xf32>
    %428 = vector.multi_reduction <add>, %427, %cst_118 [1] : vector<16x32xf32> to vector<16xf32>
    %429 = vector.shape_cast %428 : vector<16xf32> to vector<16x1xf32>
    %cst_119 = arith.constant 3.200000e+01 : f32
    %430 = vector.broadcast %cst_119 : f32 to vector<16x1xf32>
    %431 = arith.divf %429, %430 : vector<16x1xf32>
    %432 = vector.broadcast %431 : vector<16x1xf32> to vector<16x32xf32>
    %433 = arith.subf %427, %432 : vector<16x32xf32>
    %434 = arith.mulf %433, %433 : vector<16x32xf32>
    %cst_120 = arith.constant dense<0.000000e+00> : vector<16xf32>
    %435 = vector.multi_reduction <add>, %434, %cst_120 [1] : vector<16x32xf32> to vector<16xf32>
    %436 = vector.shape_cast %435 : vector<16xf32> to vector<16x1xf32>
    %cst_121 = arith.constant 3.200000e+01 : f32
    %437 = vector.broadcast %cst_121 : f32 to vector<16x1xf32>
    %438 = arith.divf %436, %437 : vector<16x1xf32>
    %439 = vector.broadcast %431 : vector<16x1xf32> to vector<16x32xf32>
    %440 = arith.subf %427, %439 : vector<16x32xf32>
    %cst_122 = arith.constant 9.99999974E-6 : f32
    %441 = vector.broadcast %cst_122 : f32 to vector<16x1xf32>
    %442 = arith.addf %438, %441 : vector<16x1xf32>
    %443 = math.rsqrt %442 : vector<16x1xf32>
    %444 = vector.broadcast %443 : vector<16x1xf32> to vector<16x32xf32>
    %445 = arith.mulf %440, %444 : vector<16x32xf32>
    %446 = vector.broadcast %24 : vector<1x32xf32> to vector<16x32xf32>
    %447 = arith.mulf %445, %446 : vector<16x32xf32>
    %448 = vector.broadcast %25 : vector<1x32xf32> to vector<16x32xf32>
    %449 = arith.addf %447, %448 : vector<16x32xf32>
    %450 = vector.broadcast %1 : vector<16x1xf32> to vector<16x32xf32>
    %451 = arith.mulf %449, %450 : vector<16x32xf32>
    %452 = vector.extract_strided_slice %9 {offsets = [0, 128], sizes = [32, 64], strides = [1, 1]} : vector<32x192xf32> to vector<32x64xf32>
    %cst_123 = arith.constant dense<0.000000e+00> : vector<16x64xf32>
    %453 = tpu.matmul %451, %452, %cst_123 {dimension_numbers = #tpu.dot_dimension_numbers<[1], [0], [0], [1], [0, 0, 1, 1], [], []>} : vector<16x32xf32>, vector<32x64xf32>, vector<16x64xf32> -> vector<16x64xf32>
    %454 = vector.broadcast %22 : vector<1x64xf32> to vector<16x64xf32>
    %455 = arith.addf %453, %454 : vector<16x64xf32>
    %cst_124 = arith.constant 0.000000e+00 : f32
    %456 = vector.broadcast %cst_124 : f32 to vector<16x64xf32>
    %457 = arith.maximumf %455, %456 : vector<16x64xf32>
    %458 = vector.broadcast %1 : vector<16x1xf32> to vector<16x64xf32>
    %459 = arith.mulf %457, %458 : vector<16x64xf32>
    %cst_125 = arith.constant dense<0.000000e+00> : vector<16x32xf32>
    %460 = tpu.matmul %459, %11, %cst_125 {dimension_numbers = #tpu.dot_dimension_numbers<[1], [0], [0], [1], [0, 0, 1, 1], [], []>} : vector<16x64xf32>, vector<64x32xf32>, vector<16x32xf32> -> vector<16x32xf32>
    %461 = vector.broadcast %23 : vector<1x32xf32> to vector<16x32xf32>
    %462 = arith.addf %460, %461 : vector<16x32xf32>
    %463 = vector.broadcast %1 : vector<16x1xf32> to vector<16x32xf32>
    %464 = arith.mulf %462, %463 : vector<16x32xf32>
    %465 = arith.addf %449, %464 : vector<16x32xf32>
    %cst_126 = arith.constant dense<0.000000e+00> : vector<16xf32>
    %466 = vector.multi_reduction <add>, %465, %cst_126 [1] : vector<16x32xf32> to vector<16xf32>
    %467 = vector.shape_cast %466 : vector<16xf32> to vector<16x1xf32>
    %cst_127 = arith.constant 3.200000e+01 : f32
    %468 = vector.broadcast %cst_127 : f32 to vector<16x1xf32>
    %469 = arith.divf %467, %468 : vector<16x1xf32>
    %470 = vector.broadcast %469 : vector<16x1xf32> to vector<16x32xf32>
    %471 = arith.subf %465, %470 : vector<16x32xf32>
    %472 = arith.mulf %471, %471 : vector<16x32xf32>
    %cst_128 = arith.constant dense<0.000000e+00> : vector<16xf32>
    %473 = vector.multi_reduction <add>, %472, %cst_128 [1] : vector<16x32xf32> to vector<16xf32>
    %474 = vector.shape_cast %473 : vector<16xf32> to vector<16x1xf32>
    %cst_129 = arith.constant 3.200000e+01 : f32
    %475 = vector.broadcast %cst_129 : f32 to vector<16x1xf32>
    %476 = arith.divf %474, %475 : vector<16x1xf32>
    %477 = vector.broadcast %469 : vector<16x1xf32> to vector<16x32xf32>
    %478 = arith.subf %465, %477 : vector<16x32xf32>
    %cst_130 = arith.constant 9.99999974E-6 : f32
    %479 = vector.broadcast %cst_130 : f32 to vector<16x1xf32>
    %480 = arith.addf %476, %479 : vector<16x1xf32>
    %481 = math.rsqrt %480 : vector<16x1xf32>
    %482 = vector.broadcast %481 : vector<16x1xf32> to vector<16x32xf32>
    %483 = arith.mulf %478, %482 : vector<16x32xf32>
    %484 = vector.broadcast %26 : vector<1x32xf32> to vector<16x32xf32>
    %485 = arith.mulf %483, %484 : vector<16x32xf32>
    %486 = vector.broadcast %27 : vector<1x32xf32> to vector<16x32xf32>
    %487 = arith.addf %485, %486 : vector<16x32xf32>
    %c0_131 = arith.constant 0 : index
    %c0_132 = arith.constant 0 : index
    %488 = vector.load %arg10[%c0_131, %c0_132] : memref<16x32xf32, #tpu.memory_space<vmem>>, vector<16x32xf32>
    tpu.vector_store %arg10[%c0_131, %c0_132], %487 {strides = array<i32>} : memref<16x32xf32, #tpu.memory_space<vmem>>, vector<16x32xf32>,
    %c1_i32_133 = arith.constant 1 : i32
    %489 = arith.cmpi eq, %arg1, %c1_i32_133 : i32
    %490 = arith.extui %489 : i1 to i32
    %c0_i32_134 = arith.constant 0 : i32
    %491 = arith.cmpi ne, %490, %c0_i32_134 : i32
    scf.if %491 {
      %492 = vector.broadcast %1 : vector<16x1xf32> to vector<16x32xf32>
      %493 = arith.mulf %487, %492 : vector<16x32xf32>
      %c0_135 = arith.constant 0 : index
      %c0_136 = arith.constant 0 : index
      %c0_137 = arith.constant 0 : index
      %494 = vector.load %arg9[%c0_135, %c0_136, %c0_137] : memref<1x16x32xf32, #tpu.memory_space<vmem>>, vector<1x16x32xf32>
      %495 = vector.shape_cast %494 : vector<1x16x32xf32> to vector<16x32xf32>
      %496 = vector.shape_cast %493 : vector<16x32xf32> to vector<1x16x32xf32>
      tpu.vector_store %arg9[%c0_135, %c0_136, %c0_137], %496 {strides = array<i32>} : memref<1x16x32xf32, #tpu.memory_space<vmem>>, vector<1x16x32xf32>,
    } else {
    }
    return
  }
  func.func @transform_0(%arg0: i32, %arg1: i32) -> (i32, i32, i32) {
    %c0_i32 = arith.constant 0 : i32
    %c0_i32_0 = arith.constant 0 : i32
    %c0_i32_1 = arith.constant 0 : i32
    return %arg0, %c0_i32, %c0_i32_0 : i32, i32, i32
  }
  func.func @transform_1(%arg0: i32, %arg1: i32) -> (i32, i32, i32) {
    %c0_i32 = arith.constant 0 : i32
    %c0_i32_0 = arith.constant 0 : i32
    %c0_i32_1 = arith.constant 0 : i32
    return %arg0, %c0_i32, %c0_i32_0 : i32, i32, i32
  }
  func.func @transform_2(%arg0: i32, %arg1: i32) -> (i32, i32, i32) {
    %c0_i32 = arith.constant 0 : i32
    %c0_i32_0 = arith.constant 0 : i32
    %c0_i32_1 = arith.constant 0 : i32
    return %arg0, %c0_i32, %c0_i32_0 : i32, i32, i32
  }
  func.func @transform_3(%arg0: i32, %arg1: i32) -> (i32, i32, i32) {
    %c0_i32 = arith.constant 0 : i32
    %c0_i32_0 = arith.constant 0 : i32
    %c0_i32_1 = arith.constant 0 : i32
    return %arg1, %c0_i32, %c0_i32_0 : i32, i32, i32
  }
  func.func @transform_4(%arg0: i32, %arg1: i32) -> (i32, i32, i32) {
    %c0_i32 = arith.constant 0 : i32
    %c0_i32_0 = arith.constant 0 : i32
    %c0_i32_1 = arith.constant 0 : i32
    return %arg1, %c0_i32, %c0_i32_0 : i32, i32, i32
  }
  func.func @transform_5(%arg0: i32, %arg1: i32) -> (i32, i32, i32) {
    %c0_i32 = arith.constant 0 : i32
    %c0_i32_0 = arith.constant 0 : i32
    %c0_i32_1 = arith.constant 0 : i32
    return %arg1, %c0_i32, %c0_i32_0 : i32, i32, i32
  }
  func.func @transform_6(%arg0: i32, %arg1: i32) -> (i32, i32, i32, i32) {
    %c0_i32 = arith.constant 0 : i32
    %c0_i32_0 = arith.constant 0 : i32
    %c0_i32_1 = arith.constant 0 : i32
    %c0_i32_2 = arith.constant 0 : i32
    return %arg1, %c0_i32, %c0_i32_0, %c0_i32_1 : i32, i32, i32, i32
  }
  func.func @transform_7(%arg0: i32, %arg1: i32) -> (i32, i32, i32) {
    %c0_i32 = arith.constant 0 : i32
    %c0_i32_0 = arith.constant 0 : i32
    %c0_i32_1 = arith.constant 0 : i32
    return %arg0, %c0_i32, %c0_i32_0 : i32, i32, i32
  }
}

</mosaic_0001>

<bundles_post_ra>
// kernel: tpu_custom_call.1
= control target key start
LH: loop header
LB: loop body
LE: loop exit
PB: predicated region body
PF: predicated region fallthrough
CT: control target
= control target key end

     0   :  { %s2748_s0 = inlined_call_operand.vmem [shape: f32[2,16,32], index: 0, kind: input, shape index: {}]   ;;  %s2749_s1 = inlined_call_operand.vmem [shape: f32[2,16,1], index: 1, kind: input, shape index: {}]   ;;  %s2750_s2 = inlined_call_operand.vmem [shape: f32[2,1,16], index: 2, kind: input, shape index: {}]   ;;  %s2751_s3 = inlined_call_operand.vmem [shape: f32[2,32,192], index: 3, kind: input, shape index: {}]   ;;  %s2752_s4 = inlined_call_operand.vmem [shape: f32[2,64,32], index: 4, kind: input, shape index: {}]   ;;  %s2753_s5 = inlined_call_operand.vmem [shape: f32[2,4,96], index: 5, kind: input, shape index: {}]   ;;  %s2754_s6 = inlined_call_operand.vmem [shape: f32[2,2,9,16], index: 6, kind: input, shape index: {}]   ;;  %s2755_s7 = inlined_call_operand.hbm [shape: f32[2,16,32], index: 7, kind: output, shape index: {}]  }
   0x1   :  { %2769 = sst [smem:[#allocation13_spill]] %s2748_s0 }
   0x2   :  { %2770 = sst [smem:[#allocation14_spill]] %s2749_s1 }
   0x3   :  { %12 = vsyncpa [#allocation4], 0 }
   0x4   :  { %14 = vsyncpa [#allocation4 + $0x1], 0  ;;  %s2027_s24 = smov 0   ;;  %s2029_s25 = smov 0  }
   0x5   :  { %s2031_s26 = smov 0   ;;  %s2033_s27 = smov 0  }
   0x6   :  { %s2035_s28 = smov 0   ;;  %s2037_s29 = smov 0  }
   0x7   :  { %s2039_s30 = smov 0   ;;  %s2041_s8 = smov 0  }
   0x8 LB: > { %2771 = sst [smem:[#allocation6_spill]] %s1945_s26  ;;  %s1625_s9 = sadd.s32 4294967295, %s1965_s8   ;;  %s1965_s8 = sphi %s2041_s8, %s20_s8   ;;  %s1961_s30 = sphi %s2039_s30, %s2819_s30   ;;  %s1957_s29 = sphi %s2037_s29, %s2818_s29   ;;  %s1953_s28 = sphi %s2035_s28, %s2817_s28   ;;  %s1949_s27 = sphi %s2033_s27, %s2816_s27   ;;  %s1945_s26 = sphi %s2031_s26, %s2815_s26   ;;  %s1941_s25 = sphi %s2029_s25, %s2821_s25   ;;  %s1937_s24 = sphi %s2027_s24, %s2820_s24  }
   0x9   : > { %2772 = sst [smem:[#allocation7_spill]] %s1957_s29  ;;  %s1626_s10 = sadd.s32 4294967294, %s1965_s8  }
   0xa   : > { %2773 = sst [smem:[#allocation8_spill]] %s1961_s30  ;;  %s29_s11 = sadd.s32 1, %s1957_s29 }
   0xb   : > { %p30_p0 = scmp.ge.s32.totalorder %s29_s11, 2  ;;  %s32_s12 = sadd.s32 1, %s1961_s30 }
   0xc   : > { %p231_p1 = scmp.ne.s32.totalorder %s1945_s26, %s1941_s25  ;;  %p232_p2 = scmp.eq.s32.totalorder %s1625_s9, 3 }
   0xd   : > { %s2823_s11 = smov (%p30_p0, %s29_s11), 0  ;;  %s2825_s12 = smov (!%p30_p0, %s32_s12), %s1961_s30 }
   0xe   : > { %2774 = sst [smem:[#allocation9_spill]] %s2823_s11  ;;  %p2076_p3 = por %p232_p2, %p231_p1 }
   0xf   : > { %p237_p4 = scmp.ne.s32.totalorder %s1941_s25, %s1937_s24  ;;  %p34_p5 = scmp.ge.s32.totalorder %s2825_s12, 2 }
  0x10   : > { %p238_p6 = scmp.eq.s32.totalorder %s1626_s10, 3  ;;  %p1629_p7 = scmp.ge.s32.totalorder %s1965_s8, 1 }
  0x11   : > { %p309_p8 = scmp.lt.s32.totalorder %s1965_s8, 5  ;;  %s2827_s12 = smov (%p34_p5, %s2825_s12), 0 }
  0x12   : > { %2776 = sst [smem:[#allocation10_spill]] %s2827_s12  ;;  %p2086_p9 = por %p238_p6, %p237_p4 }
  0x13   : > { %p310_p10 = pnand %p1629_p7, %p309_p8  ;;  %s218_s15 = ssub.s32 %s1961_s30, %s2827_s12 }
  0x14   : > { %s2777_s14 = scalar_select %p2086_p9, 1, 0 }
  0x15   : > { %s221_s16 = sadd.s32 1, %s1945_s26  ;;  %p219_p11 = scmp.eq.s32.totalorder %s218_s15, 0 }
  0x16   : > { %2778 = sst [smem:[#allocation11_spill]] %s2777_s14  ;;  %313 = sbr.rel (%p310_p10) target bundleno = 2612 (0xa34), region = 48 }
  0x17   : > { %s2094_s17 = scalar_select %p219_p11, %s1945_s26, %s221_s16  }
  0x18   : > { %s2759_s18 = sand.u32 (!%p310_p10), 1, %s1941_s25   ;;  %p368_p12 = scmp.lt.s32.totalorder (!%p310_p10), %s1953_s28, 1 }
  0x19   : > { %2779 = sst [smem:[#allocation12_spill]] %s2094_s17  ;;  %s1630_s19 = sshll.u32 (!%p310_p10), %s2759_s18, 4 }
  0x1a   : > { %p381_p13 = scmp.lt.s32.totalorder (!%p310_p10), %s1949_s27, 1  ;;  %s2780_s0 = sld [smem:[#allocation13_spill]] (!%p310_p10) }
  0x1b   : > { %s369_s20 = scalar_select %p368_p12, %s1953_s28, 1 }
  0x1c   : > { %s382_s21 = scalar_select %p381_p13, %s1949_s27, 1 }
  0x1d   : > { %s1677_s22 = sshll.u32 %s369_s20, 4  ;;  %s380_s10 = scalar_lea.vmem %s2750_s2, %s369_s20 }
  0x1e   : > { %s2781_s1 = sld [smem:[#allocation14_spill]]  ;;  %v2112_v0 = vld [vmem:[%s380_s10] sm:$0x1]  ;;  %s1679_s17 = sshll.u32 %s382_s21, 6 }
  0x1f   : > { %s1639_s18 = sshll.u32 %s382_s21, 2  ;;  %s2119_s23 = scalar_lea.vmem %s2751_s3, %s1679_s17 }
  0x20   : > { %s372_s12 = scalar_lea.vmem %s2780_s0, %s1677_s22  ;;  %s2124_s15 = scalar_lea.vmem %s2752_s4, %s1679_s17 }
  0x21   : > { %s2129_s11 = scalar_lea.vmem %s2753_s5, %s1639_s18  ;;  %p1642_p0 = scmp.ne.s32.totalorder %s1949_s27, 0 }
  0x23   : > { %406 = sbr.rel (%p1642_p0) target bundleno = 168 (0xa8), region = 52 }
  0x24   : > { %s377_s29 = scalar_lea.vmem %s2781_s1, %s1677_s22  ;;  %s1681_s22 = sshll.u32 %s382_s21, 5 }
  0x25   : > { %v2114_v1 = vld [vmem:[%s377_s29] sm:$0xff]  ;;  %v401_v2 = vld [vmem:[%s377_s29 + $0x8] sm:$0xff]  ;;  %s2134_s29 = scalar_lea.vmem %s2754_s6, %s1681_s22  ;;  %s2136_s1 = scalar_lea.vmem [#allocation3], %s1630_s19 }
  0x28   : > { %v1967_v3 = vmov 0   ;;  %v407_v4 = vld [vmem:[%s372_s12] sm:$0xff]  ;;  %vm421_vm0 = vcmask 261120   ;;  %v408_v7 = vld [vmem:[%s372_s12 + $0x8] sm:$0xff] }
  0x29   : > { %1780 = vset.pattern.permute.xlu0 %v1967_v3 }
  0x2a   : > { %411 = vperm.xlu0 %1780, %v2114_v1  }
  0x32   : > { %416 = vperm.xlu0 %1780, %v401_v2  }
  0x9c   : > { %v412_v5 = vpop.permute.xlu0 %411 }
  0x9d   : > { %v419_v6 = vmul.f32 %v412_v5, %v407_v4 }
  0x9f   : > { %422 = vst.msk [vmem:[#allocation2] sm:$0xff] %vm421_vm0, %v419_v6 }
  0xa4   : > { %v417_v8 = vpop.permute.xlu0 %416 }
  0xa5   : > { %v420_v9 = vmul.f32 %v417_v8, %v408_v7 }
  0xa7   : > { %423 = vst.msk [vmem:[#allocation2 + $0x8] sm:$0xff] %vm421_vm0, %v420_v9 }
  0xa8 PF: > { %v2141_v10 = vld [vmem:[%s2119_s23 + $0x30] sm:$0xff]  ;;  %v2144_v11 = vld [vmem:[%s2119_s23 + $0x20] sm:$0xff]  ;;  %vm512_vm1 = vcmask 130048   ;;  %v444_v13 = vld [vmem:[%s2134_s29 + $0x8] sm:$0x1]  ;;  %vm2762_vm2 = vcmask 261120   ;;  %v466_v42 = vlaneseq }
  0xa9   : > { %493 = vmatpush.msra.mxu0 %v2141_v10  ;;  %1683 = vmatpush.msra.mxu1 %v2141_v10  ;;  %v428_v12 = vld [vmem:[%s2119_s23 + $0x10] sm:$0xff]  ;;  %v426_v14 = vld [vmem:[%s2119_s23] sm:$0xff]  ;;  %s1968_s0 = smov 96   ;;  %v1969_v26 = vmov 0   ;;  %v1970_v27 = vmov 3   ;;  %v1971_v28 = vmov 1  }
  0xaa   : > { %1649 = vmatpush.xpose.msk.msra.mxu2 %vm512_vm1, %v444_v13  ;;  %v424_v15 = vld [vmem:[#allocation2] sm:$0xff]  ;;  %1781 = vset.pattern.permute.xlu1 %v1969_v26  ;;  %v1972_v33 = vmov 8   ;;  %v1973_v34 = vmov 2   ;;  %v1974_v35 = vmov 4   ;;  %v1975_v36 = vmov 5   ;;  %s1978_s26 = smov 112  }
  0xab   : > { %494 = vmatpush.msra.mxu0 %v2144_v11  ;;  %1684 = vmatpush.msra.mxu1 %v2144_v11  ;;  %v443_v17 = vld [vmem:[%s2134_s29] sm:$0xff]  ;;  %v1976_v37 = vmov 6   ;;  %v1977_v38 = vmov 7   ;;  %s1979_s12 = smov 64   ;;  %s1980_s14 = smov 80   ;;  %v458_v43 = vperm.slane %v2112_v0, 0 }
  0xac   : > { %v442_v18 = vld [vmem:[%s2129_s11] sm:$0xf]  ;;  %454 = vperm.xlu1 %1781, %v401_v2   ;;  %1784 = vset.pattern.permute.xlu0 %v1970_v27  ;;  %v2192_v45 = vshrl.u32 %v466_v42, 7  ;;  %v2200_v50 = vand.u32 127, %v466_v42  ;;  %s1981_s17 = smov 48   ;;  %s1982_s18 = smov 32  }
  0xad   : > { %495 = vmatpush.msra.mxu0 %v428_v12  ;;  %1685 = vmatpush.msra.mxu1 %v428_v12  ;;  %v473_v19 = vperm.slane %v442_v18, 0  ;;  %s1983_s19 = smov 16   ;;  %p1671_p1 = scmp.ne.s32.totalorder %s1949_s27, 1 }
  0xae   : > { %v425_v16 = vld [vmem:[#allocation2 + $0x8] sm:$0xff]  ;;  %1650 = vmatpush.xpose.msk.msra.mxu2 %vm512_vm1, %v443_v17  ;;  %1782 = vset.pattern.permute.xlu2 %v1971_v28  ;;  %v468_v49 = vadd.s32 8, %v2192_v45 }
  0xaf   : > { %496 = vmatpush.msra.mxu0 %v426_v14  ;;  %1686 = vmatpush.msra.mxu1 %v426_v14 }
  0xb0   : > { %1643 = vmatmul.msk.f32.vlgmr.msra.gmra.mxu0 %vm2762_vm2, %v424_v15  ;;  %1644 = vmatmul.msk.f32.vlgmr.msra.gmra.mxu1 %vm2762_vm2, %v425_v16  ;;  %v2203_v52 = vsub.s32 %v2200_v50, %v468_v49 }
  0xb1   : > { %1659 = vmatpush.xpose.msk.msrb.mxu0 %vm512_vm1, %v444_v13 }
  0xb2   : > { %vm576_vm3 = vcmp.eq.s32.totalorder %v2203_v52, 4294967292  ;;  %vm592_vm4 = vcmp.eq.s32.totalorder %v2203_v52, 4294967293  ;;  %vm606_vm5 = vcmp.eq.s32.totalorder %v2203_v52, 4294967294  ;;  %vm620_vm6 = vcmp.eq.s32.totalorder %v2203_v52, 4294967295 }
  0xb3   : > { %vm2767_vm7 = vcmp.eq.s32.totalorder %v2203_v52, 0  ;;  %vm648_vm8 = vcmp.eq.s32.totalorder %v2203_v52, 1  ;;  %vm2765_vm9 = vcmp.eq.s32.totalorder %v2203_v52, 2  ;;  %vm2764_vm10 = vcmp.eq.s32.totalorder %v2203_v52, 3 }
  0xb4   : > { %vm2763_vm11 = vcmp.eq.s32.totalorder %v2203_v52, 4 }
  0xb5   : > { %1660 = vmatpush.xpose.msk.msrb.mxu0 %vm512_vm1, %v443_v17 }
 0x11e   : > { %v2190_v44 = vpop.permute.xlu1 %454 }
 0x11f   : > { %v461_v46 = vmul.f32 %v458_v43, %v2190_v44 }
 0x121   : > { %v463_v51 = vsub.f32 1.0, %v461_v46 }
 0x123   : > { %v2206_v54 = vmul.f32 -10000.0, %v463_v51 }
 0x12d   : > { %v498_v20 = vpop.f32.mrf.mxu0  ;;  %v501_v21 = vpop.f32.mrf.mxu1 }
 0x12e   : > { %v499_v22 = vadd.f32 %v498_v20, %v473_v19  ;;  %v502_v23 = vadd.f32 %v501_v21, %v473_v19 }
 0x130   : > { %510 = vrot.lane.b32.xlu0 %v502_v23, %s1968_s0  ;;  %v504_v24 = vmul.f32 0.25, %v499_v22  ;;  %v505_v25 = vmul.f32 0.25, %v502_v23  ;;  %v2183_v39 = vpack.i.bf16 %v499_v22, %v502_v23 }
 0x132   : > { %1651 = vmatmul.msk.f32.vlgmr.msra.gmra.mxu2 %vm512_vm1, %v504_v24 }
 0x138   : > { %508 = vrot.lane.b32.xlu0 %v499_v22, %s1968_s0 }
 0x13a   : > { %1652 = vmatmul.msk.f32.gmra.mxu2 %vm512_vm1, %v505_v25 }
 0x1a2   : > { %v511_v29 = vpop.permute.xlu0 %510 }
 0x1a3   : > { %1645 = vmatpush.xpose.msk.msrb.mxu1 %vm512_vm1, %v511_v29 }
 0x1aa   : > { %v509_v30 = vpop.permute.xlu0 %508 }
 0x1ab   : > { %1646 = vmatpush.xpose.msk.msrb.mxu1 %vm512_vm1, %v509_v30 }
 0x1ae   : > { %1647 = vmatmul.msk.f32.vlgmr.msrb.gmra.mxu1 %vm512_vm1, %v504_v24 }
 0x1b5   : > { %v2171_v31 = vpop.f32.mrf.mxu2 }
 0x1b6   : > { %1648 = vmatmul.msk.f32.gmra.mxu1 %vm512_vm1, %v505_v25 }
 0x1bd   : > { %v572_v32 = vpop.f32.mrf.mxu2 }
 0x1be   : > { %626 = vperm.xlu0 %1784, %v572_v32   ;;  %598 = vperm.xlu2 %1782, %v572_v32  }
 0x1bf   : > { %584 = vperm.xlu1 %1781, %v572_v32  }
 0x1c6   : > { %1789 = vset.pattern.permute.xlu0 %v1972_v33  ;;  %1783 = vset.pattern.permute.xlu2 %v1973_v34 }
 0x1c7   : > { %1785 = vset.pattern.permute.xlu1 %v1974_v35  ;;  %696 = vperm.xlu0 %1789, %v572_v32  }
 0x1c8   : > { %612 = vperm.xlu2 %1783, %v572_v32   ;;  %640 = vperm.xlu1 %1785, %v572_v32  }
 0x1cf   : > { %1799 = vset.pattern.permute.xlu0 %v1970_v27 }
 0x1d0   : > { %1786 = vset.pattern.permute.xlu2 %v1975_v36  ;;  %1787 = vset.pattern.permute.xlu1 %v1976_v37 }
 0x1d1   : > { %654 = vperm.xlu2 %1786, %v572_v32   ;;  %668 = vperm.xlu1 %1787, %v572_v32  }
 0x1d9   : > { %1788 = vset.pattern.permute.xlu2 %v1977_v38  ;;  %1796 = vset.pattern.permute.xlu1 %v1969_v26 }
 0x1da   : > { %682 = vperm.xlu2 %1788, %v572_v32  }
 0x1e2   : > { %875 = vrot.lane.b32.xlu2 %v504_v24, %s1978_s26 }
 0x1e3   : > { %1795 = vset.pattern.permute.xlu2 %v1969_v26 }
 0x1ea   : > { %877 = vrot.lane.b32.xlu2 %v505_v25, %s1978_s26 }
 0x1f2   : > { %1791 = vrot.lane.b32.xlu2 %v2183_v39, %s1979_s12 }
 0x1fa   : > { %881 = vrot.lane.b32.xlu2 %v502_v23, %s1980_s14 }
 0x202   : > { %879 = vrot.lane.b32.xlu2 %v499_v22, %s1980_s14 }
 0x20a   : > { %449 = vperm.xlu2 %1795, %v2114_v1  }
 0x212   : > { %1797 = vset.pattern.permute.xlu2 %v1971_v28 }
 0x218   : > { %v599_v40 = vpop.permute.xlu2 %598 }
 0x219   : > { %v602_v60 = vsel %vm592_vm4, %v599_v40, 0.0 }
 0x222   : > { %v613_v41 = vpop.permute.xlu2 %612 }
 0x223   : > { %v616_v63 = vsel %vm606_vm5, %v613_v41, 0.0 }
 0x22b   : > { %v655_v47 = vpop.permute.xlu2 %654  ;;  %v2197_v48 = vpop.f32.mrf.mxu1 }
 0x22c   : > { %v658_v8 = vsel %vm648_vm8, %v655_v47, 0.0 }
 0x230   : > { %v627_v61 = vpop.permute.xlu0 %626 }
 0x231   : > { %v585_v53 = vpop.permute.xlu1 %584  ;;  %v630_v3 = vsel %vm620_vm6, %v627_v61, 0.0 }
 0x232   : > { %v588_v58 = vsel %vm576_vm3, %v585_v53, 0.0 }
 0x233   : > { %v543_v55 = vpop.f32.mrf.mxu1 }
 0x234   : > { %v683_v56 = vpop.permute.xlu2 %682  ;;  %v544_v57 = vadd.f32 %v543_v55, %v2206_v54 }
 0x235   : > { %v686_v17 = vsel %vm2764_vm10, %v683_v56, 0.0 }
 0x236   : > { %v590_v59 = vadd.f32 %v588_v58, %v544_v57 }
 0x238   : > { %v604_v62 = vadd.f32 %v602_v60, %v590_v59 }
 0x239   : > { %v697_v15 = vpop.permute.xlu0 %696 }
 0x23a   : > { %v641_v1 = vpop.permute.xlu1 %640  ;;  %v618_v2 = vadd.f32 %v616_v63, %v604_v62  ;;  %v700_v19 = vsel %vm2763_vm11, %v697_v15, 0.0 }
 0x23b   : > { %v644_v6 = vsel %vm2767_vm7, %v641_v1, 0.0 }
 0x23c   : > { %v632_v4 = vadd.f32 %v630_v3, %v618_v2  ;;  %v2221_v5 = vpop.permute.xlu2 %875  ;;  %v2330_v3 = vsub.s32 %v2200_v50, %v2192_v45 }
 0x23d   : > { %1661 = vmatmul.msk.f32.vlgmr.msrb.gmra.mxu0 %vm512_vm1, %v2221_v5 }
 0x23e   : > { %v646_v7 = vadd.f32 %v644_v6, %v632_v4  ;;  %vm575_vm12 = vcmp.eq.s32.totalorder %v2330_v3, 4294967292  ;;  %vm591_vm13 = vcmp.eq.s32.totalorder %v2330_v3, 4294967293  ;;  %vm605_vm14 = vcmp.eq.s32.totalorder %v2330_v3, 4294967294 }
 0x23f   : > { %vm619_vm15 = vcmp.eq.s32.totalorder %v2330_v3, 4294967295  ;;  %vm633_vm0 = vcmp.eq.s32.totalorder %v2330_v3, 0  ;;  %vm647_vm2 = vcmp.eq.s32.totalorder %v2330_v3, 1  ;;  %vm2766_vm11 = vcmp.eq.s32.totalorder %v2330_v3, 2 }
 0x240   : > { %v660_v12 = vadd.f32 %v658_v8, %v646_v7  ;;  %vm675_vm10 = vcmp.eq.s32.totalorder %v2330_v3, 3 }
 0x243   : > { %v669_v9 = vpop.permute.xlu1 %668 }
 0x244   : > { %v672_v13 = vsel %vm2765_vm9, %v669_v9, 0.0  ;;  %v2234_v14 = vpop.permute.xlu2 %877  ;;  %vm2768_vm9 = vcmp.eq.s32.totalorder %v2330_v3, 4 }
 0x245   : > { %v674_v16 = vadd.f32 %v672_v13, %v660_v12  ;;  %1662 = vmatmul.msk.f32.gmra.mxu0 %vm512_vm1, %v2234_v14 }
 0x247   : > { %v688_v18 = vadd.f32 %v686_v17, %v674_v16 }
 0x249   : > { %v702_v20 = vadd.f32 %v700_v19, %v688_v18 }
 0x24b   : > { %v706_v21 = vsel %vm512_vm1, %v702_v20, -inf }
 0x24c   : > { %v1792_v22 = vpop.permute.xlu2 %1791  ;;  %707 = vmax.xlane.f32.xlu1 %v706_v21 }
 0x24d   : > { %v1793_v23 = vunpack.i.l.bf16 %v1792_v22  ;;  %v1794_v24 = vunpack.i.h.bf16 %v1792_v22 }
 0x24f   : > { %762 = vmatpush.msrb.mxu2 %v1793_v23  ;;  %1687 = vmatpush.msra.mxu3 %v1793_v23 }
 0x251   : > { %763 = vmatpush.msrb.mxu2 %v1794_v24  ;;  %1688 = vmatpush.msra.mxu3 %v1794_v24 }
 0x254   : > { %v882_v25 = vpop.permute.xlu2 %881 }
 0x255   : > { %1655 = vmatpush.xpose.msk.msrb.mxu3 %vm512_vm1, %v882_v25 }
 0x25c   : > { %v880_v29 = vpop.permute.xlu2 %879 }
 0x25d   : > { %1656 = vmatpush.xpose.msk.msrb.mxu3 %vm512_vm1, %v880_v29 }
 0x2ba   : > { %v931_v30 = vpop.f32.mrf.mxu0 }
 0x2bb   : > { %952 = vperm.xlu2 %1797, %v931_v30   ;;  %939 = vperm.xlu1 %1796, %v931_v30  }
 0x2bf   : > { %v708_v32 = vpop.xlane.xlu1 %707 }
 0x2c0   : > { %v710_v40 = vsub.f32 %v702_v20, %v708_v32 }
 0x2c2   : > { %v713_v41 = vmul.f32 1.442695, %v710_v40  ;;  %v934_v47 = vpop.f32.mrf.mxu0 }
 0x2c3   : > { %1798 = vset.pattern.permute.xlu2 %v1973_v34  ;;  %1801 = vset.pattern.permute.xlu1 %v1974_v35 }
 0x2c4   : > { %1840 = vpow2.f32 %v713_v41  ;;  %964 = vperm.xlu2 %1798, %v931_v30   ;;  %988 = vperm.xlu1 %1801, %v931_v30  }
 0x2ca   : > { %v1841_v42 = vpop.eup %1840 }
 0x2cb   : > { %v718_v46 = vsel %vm512_vm1, %v1841_v42, 0.0 }
 0x2cc   : > { %1800 = vset.pattern.permute.xlu2 %v1969_v26  ;;  %1803 = vset.pattern.permute.xlu1 %v1975_v36 }
 0x2cd   : > { %719 = vadd.xlane.f32.xlu0 %v718_v46  ;;  %944 = vperm.xlu2 %1800, %v934_v47  }
 0x2ce   : > { %1000 = vperm.xlu1 %1803, %v931_v30  }
 0x2d5   : > { %1802 = vset.pattern.permute.xlu2 %v1971_v28 }
 0x2d6   : > { %1805 = vset.pattern.permute.xlu1 %v1976_v37  ;;  %956 = vperm.xlu2 %1802, %v934_v47  }
 0x2d7   : > { %1012 = vperm.xlu1 %1805, %v931_v30  }
 0x2de   : > { %1804 = vset.pattern.permute.xlu2 %v1973_v34 }
 0x2df   : > { %1807 = vset.pattern.permute.xlu1 %v1977_v38  ;;  %968 = vperm.xlu2 %1804, %v934_v47  }
 0x2e0   : > { %1024 = vperm.xlu1 %1807, %v931_v30  }
 0x2e1   : > { %976 = vperm.xlu0 %1799, %v931_v30  }
 0x2e7   : > { %1806 = vset.pattern.permute.xlu2 %v1970_v27 }
 0x2e8   : > { %1810 = vset.pattern.permute.xlu1 %v1975_v36  ;;  %980 = vperm.xlu2 %1806, %v934_v47  }
 0x2e9   : > { %1004 = vperm.xlu1 %1810, %v934_v47   ;;  %1809 = vset.pattern.permute.xlu0 %v1972_v33 }
 0x2ea   : > { %1036 = vperm.xlu0 %1809, %v931_v30  }
 0x2f0   : > { %1808 = vset.pattern.permute.xlu2 %v1974_v35 }
 0x2f1   : > { %1812 = vset.pattern.permute.xlu1 %v1977_v38  ;;  %992 = vperm.xlu2 %1808, %v934_v47  }
 0x2f2   : > { %1028 = vperm.xlu1 %1812, %v934_v47   ;;  %1814 = vset.pattern.permute.xlu0 %v1969_v26  ;;  %v2275_v26 = vpop.permute.xlu2 %449 }
 0x2f3   : > { %579 = vperm.xlu0 %1814, %v2171_v31   ;;  %v460_v62 = vmul.f32 %v458_v43, %v2275_v26 }
 0x2f5   : > { %v462_v2 = vsub.f32 1.0, %v460_v62 }
 0x2f7   : > { %v464_v4 = vmul.f32 -10000.0, %v462_v2 }
 0x2f9   : > { %1811 = vset.pattern.permute.xlu2 %v1976_v37  ;;  %v541_v0 = vadd.f32 %v2197_v48, %v464_v4 }
 0x2fa   : > { %1815 = vset.pattern.permute.xlu1 %v1971_v28  ;;  %1016 = vperm.xlu2 %1811, %v934_v47  }
 0x2fb   : > { %594 = vperm.xlu1 %1815, %v2171_v31   ;;  %1819 = vset.pattern.permute.xlu0 %v1975_v36 }
 0x2fc   : > { %650 = vperm.xlu0 %1819, %v2171_v31  }
 0x302   : > { %1813 = vset.pattern.permute.xlu2 %v1972_v33 }
 0x303   : > { %1817 = vset.pattern.permute.xlu1 %v1970_v27  ;;  %1040 = vperm.xlu2 %1813, %v934_v47  }
 0x304   : > { %622 = vperm.xlu1 %1817, %v2171_v31   ;;  %1838 = vset.pattern.permute.xlu0 %v1972_v33 }
 0x30b   : > { %1816 = vset.pattern.permute.xlu2 %v1973_v34 }
 0x30c   : > { %1820 = vset.pattern.permute.xlu1 %v1976_v37  ;;  %608 = vperm.xlu2 %1816, %v2171_v31  }
 0x30d   : > { %664 = vperm.xlu1 %1820, %v2171_v31  }
 0x314   : > { %1818 = vset.pattern.permute.xlu2 %v1974_v35 }
 0x315   : > { %1822 = vset.pattern.permute.xlu1 %v1972_v33  ;;  %636 = vperm.xlu2 %1818, %v2171_v31   ;;  %v2280_v27 = vpop.permute.xlu2 %952 }
 0x316   : > { %692 = vperm.xlu1 %1822, %v2171_v31   ;;  %v959_v62 = vsel %vm591_vm13, %v2280_v27, 0.0 }
 0x31d   : > { %1821 = vset.pattern.permute.xlu2 %v1977_v38 }
 0x31e   : > { %678 = vperm.xlu2 %1821, %v2171_v31   ;;  %v2285_v28 = vpop.permute.xlu2 %964 }
 0x327   : > { %v2287_v34 = vpop.permute.xlu2 %944 }
 0x32d   : > { %v2289_v36 = vpop.permute.xlu1 %939 }
 0x330   : > { %v2291_v37 = vpop.permute.xlu2 %956 }
 0x336   : > { %v2293_v35 = vpop.permute.xlu1 %988 }
 0x337   : > { %v995_v27 = vsel %vm633_vm0, %v2293_v35, 0.0 }
 0x339   : > { %v2295_v33 = vpop.permute.xlu2 %968 }
 0x340   : > { %v720_v49 = vpop.xlane.xlu0 %719  ;;  %v2297_v51 = vpop.permute.xlu1 %1000 }
 0x341   : > { %1842 = vrcp.f32 %v720_v49  ;;  %v947_v49 = vsel %vm575_vm12, %v2289_v36, 0.0  ;;  %v948_v36 = vsel %vm576_vm3, %v2287_v34, 0.0  ;;  %v972_v34 = vsel %vm606_vm5, %v2295_v33, 0.0 }
 0x342   : > { %v2301_v31 = vpop.permute.xlu2 %980 }
 0x347   : > { %v1843_v53 = vpop.eup %1842 }
 0x348   : > { %v2299_v38 = vmul.f32 %v1843_v53, %v1841_v42 }
 0x349   : > { %v2303_v55 = vpop.permute.xlu1 %1012 }
 0x34a   : > { %1654 = vmatmul.msk.f32.vlgmr.msra.gmra.mxu3 %vm512_vm1, %v2299_v38  ;;  %v1019_v35 = vsel %vm2766_vm11, %v2303_v55, 0.0 }
 0x34b   : > { %v2307_v56 = vpop.permute.xlu2 %992 }
 0x34c   : > { %v996_v33 = vsel %vm2767_vm7, %v2307_v56, 0.0  ;;  %vm2783_vm7 = vcmp.eq.s32.totalorder %v2203_v52, 3 }
 0x352   : > { %1657 = vmatmul.msk.f32.vlgmr.msrb.gmra.mxu3 %vm512_vm1, %v2221_v5  ;;  %v2311_v57 = vpop.permute.xlu1 %1024 }
 0x353   : > { %v977_v58 = vpop.permute.xlu0 %976 }
 0x354   : > { %v2317_v60 = vpop.permute.xlu2 %1016 }
 0x35a   : > { %1658 = vmatmul.msk.f32.gmra.mxu3 %vm512_vm1, %v2234_v14 }
 0x35b   : > { %v2315_v59 = vpop.permute.xlu1 %1004 }
 0x35c   : > { %v2319_v61 = vpop.permute.xlu0 %1036 }
 0x35d   : > { %v2326_v1 = vpop.permute.xlu2 %1040  ;;  %v1043_v55 = vsel %vm2768_vm9, %v2319_v61, 0.0 }
 0x364   : > { %v2324_v63 = vpop.permute.xlu1 %1028 }
 0x365   : > { %v580_v5 = vpop.permute.xlu0 %579  ;;  %v1032_v56 = vsel %vm2783_vm7, %v2324_v63, 0.0  ;;  %vm2785_vm7 = vcmp.eq.s32.totalorder %v2330_v3, 2 }
 0x366   : > { %v587_v7 = vsel %vm575_vm12, %v580_v5, 0.0  ;;  %v609_v43 = vpop.permute.xlu2 %608  ;;  %v971_v5 = vsel %vm605_vm14, %v2285_v28, 0.0  ;;  %v960_v28 = vsel %vm592_vm4, %v2291_v37, 0.0  ;;  %v984_v37 = vsel %vm620_vm6, %v2301_v31, 0.0 }
 0x367   : > { %v589_v9 = vadd.f32 %v587_v7, %v541_v0  ;;  %v615_v50 = vsel %vm605_vm14, %v609_v43, 0.0  ;;  %v983_v7 = vsel %vm619_vm15, %v977_v58, 0.0  ;;  %v1007_v58 = vsel %vm647_vm2, %v2297_v51, 0.0 }
 0x368   : > { %v1031_v51 = vsel %vm675_vm10, %v2311_v57, 0.0  ;;  %v1008_v31 = vsel %vm648_vm8, %v2315_v59, 0.0 }
 0x36d   : > { %v595_v6 = vpop.permute.xlu1 %594 }
 0x36e   : > { %v601_v8 = vsel %vm591_vm13, %v595_v6, 0.0  ;;  %v651_v17 = vpop.permute.xlu0 %650 }
 0x36f   : > { %v603_v12 = vadd.f32 %v601_v8, %v589_v9  ;;  %v637_v15 = vpop.permute.xlu2 %636  ;;  %v657_v20 = vsel %vm647_vm2, %v651_v17, 0.0 }
 0x370   : > { %v643_v16 = vsel %vm633_vm0, %v637_v15, 0.0 }
 0x371   : > { %v617_v14 = vadd.f32 %v615_v50, %v603_v12 }
 0x376   : > { %v623_v45 = vpop.permute.xlu1 %622 }
 0x377   : > { %v629_v13 = vsel %vm619_vm15, %v623_v45, 0.0 }
 0x378   : > { %v631_v48 = vadd.f32 %v629_v13, %v617_v14  ;;  %v679_v23 = vpop.permute.xlu2 %678 }
 0x379   : > { %v685_v25 = vsel %vm675_vm10, %v679_v23, 0.0 }
 0x37a   : > { %v645_v18 = vadd.f32 %v643_v16, %v631_v48 }
 0x37c   : > { %v659_v22 = vadd.f32 %v657_v20, %v645_v18 }
 0x37f   : > { %v665_v19 = vpop.permute.xlu1 %664 }
 0x380   : > { %v671_v21 = vsel %vm2766_vm11, %v665_v19, 0.0  ;;  %vm2782_vm11 = vcmp.eq.s32.totalorder %v2203_v52, 2 }
 0x381   : > { %v673_v24 = vadd.f32 %v671_v21, %v659_v22  ;;  %v1020_v57 = vsel %vm2782_vm11, %v2317_v60, 0.0  ;;  %vm2787_vm11 = vcmp.eq.s32.totalorder %v2203_v52, 0 }
 0x383   : > { %v687_v30 = vadd.f32 %v685_v25, %v673_v24 }
 0x388   : > { %v693_v29 = vpop.permute.xlu1 %692 }
 0x389   : > { %v699_v32 = vsel %vm2768_vm9, %v693_v29, 0.0  ;;  %vm2784_vm9 = vcmp.eq.s32.totalorder %v2203_v52, 4 }
 0x38a   : > { %v701_v40 = vadd.f32 %v699_v32, %v687_v30  ;;  %v1044_v19 = vsel %vm2784_vm9, %v2326_v1, 0.0  ;;  %vm2786_vm9 = vcmp.eq.s32.totalorder %v2330_v3, 4 }
 0x38c   : > { %v703_v41 = vsel %vm512_vm1, %v701_v40, -inf }
 0x38d   : > { %704 = vmax.xlane.f32.xlu1 %v703_v41 }
 0x3cd   : > { %v2361_v42 = vpop.f32.mrf.mxu3 }
 0x3d5   : > { %v908_v46 = vpop.f32.mrf.mxu3 }
 0x3d6   : > { %v909_v47 = vadd.f32 %v908_v46, %v464_v4 }
 0x3d8   : > { %v949_v53 = vadd.f32 %v947_v49, %v909_v47 }
 0x3da   : > { %v961_v2 = vadd.f32 %v959_v62, %v949_v53 }
 0x3dc   : > { %v973_v6 = vadd.f32 %v971_v5, %v961_v2 }
 0x3dd   : > { %v911_v0 = vpop.f32.mrf.mxu3 }
 0x3de   : > { %v985_v4 = vadd.f32 %v983_v7, %v973_v6  ;;  %v912_v43 = vadd.f32 %v911_v0, %v2206_v54 }
 0x3e0   : > { %v950_v8 = vadd.f32 %v948_v36, %v912_v43  ;;  %v997_v9 = vadd.f32 %v995_v27, %v985_v4 }
 0x3e2   : > { %v962_v12 = vadd.f32 %v960_v28, %v950_v8  ;;  %v1009_v54 = vadd.f32 %v1007_v58, %v997_v9 }
 0x3e4   : > { %v974_v45 = vadd.f32 %v972_v34, %v962_v12  ;;  %v1021_v50 = vadd.f32 %v1019_v35, %v1009_v54  ;;  %v726_v34 = vsel %vm576_vm3, %v2299_v38, 0.0 }
 0x3e6   : > { %v986_v13 = vadd.f32 %v984_v37, %v974_v45  ;;  %v1033_v14 = vadd.f32 %v1031_v51, %v1021_v50  ;;  %v730_v50 = vsel %vm512_vm1, %v726_v34, 0.0  ;;  %v785_v51 = vsel %vm606_vm5, %v2299_v38, 0.0 }
 0x3e8   : > { %v1045_v15 = vadd.f32 %v1043_v55, %v1033_v14  ;;  %v998_v48 = vadd.f32 %v996_v33, %v986_v13  ;;  %v772_v14 = vsel %vm592_vm4, %v2299_v38, 0.0  ;;  %v789_v33 = vsel %vm512_vm1, %v785_v51, 0.0 }
 0x3ea   : > { %v1047_v16 = vsel %vm512_vm1, %v1045_v15, -inf  ;;  %v1010_v17 = vadd.f32 %v1008_v31, %v998_v48  ;;  %v798_v31 = vsel %vm620_vm6, %v2299_v38, 0.0 }
 0x3eb   : > { %1048 = vmax.xlane.f32.xlu2 %v1047_v16 }
 0x3ec   : > { %v1022_v18 = vadd.f32 %v1020_v57, %v1010_v17  ;;  %v802_v57 = vsel %vm512_vm1, %v798_v31, 0.0 }
 0x3ee   : > { %v1034_v61 = vadd.f32 %v1032_v56, %v1022_v18 }
 0x3f0   : > { %v1046_v20 = vadd.f32 %v1044_v19, %v1034_v61  ;;  %v811_v61 = vsel %vm2787_vm11, %v2299_v38, 0.0 }
 0x3f2   : > { %v1050_v59 = vsel %vm512_vm1, %v1046_v20, -inf }
 0x3f3   : > { %1051 = vmax.xlane.f32.xlu0 %v1050_v59 }
 0x400   : > { %v705_v21 = vpop.xlane.xlu1 %704 }
 0x401   : > { %v709_v23 = vsub.f32 %v701_v40, %v705_v21  ;;  %v824_v21 = vsel %vm648_vm8, %v2299_v38, 0.0 }
 0x403   : > { %v711_v25 = vmul.f32 1.442695, %v709_v23  ;;  %v1828_v23 = vpack.i.bf16 %v2144_v11, %v2141_v10 }
 0x407   : > { %1824 = vrot.lane.b32.xlu0 %v2183_v39, %s1981_s17 }
 0x45e   : > { %v1049_v60 = vpop.xlane.xlu2 %1048 }
 0x45f   : > { %v1053_v22 = vsub.f32 %v1045_v15, %v1049_v60  ;;  %v776_v15 = vsel %vm512_vm1, %v772_v14, 0.0 }
 0x461   : > { %v1055_v24 = vmul.f32 1.442695, %v1053_v22  ;;  %v828_v22 = vsel %vm512_vm1, %v824_v21, 0.0 }
 0x463   : > { %1844 = vpow2.f32 %v1055_v24 }
 0x464   : > { %1846 = vpow2.f32 %v711_v25 }
 0x466   : > { %v1052_v63 = vpop.xlane.xlu0 %1051 }
 0x467   : > { %v1054_v29 = vsub.f32 %v1046_v20, %v1052_v63  ;;  %v815_v20 = vsel %vm512_vm1, %v811_v61, 0.0 }
 0x469   : > { %v1845_v30 = vpop.eup %1844  ;;  %v1057_v32 = vmul.f32 1.442695, %v1054_v29 }
 0x46a   : > { %v1059_v1 = vsel %vm512_vm1, %v1845_v30, 0.0  ;;  %v1847_v41 = vpop.eup %1846 }
 0x46b   : > { %1848 = vpow2.f32 %v1057_v32  ;;  %1060 = vadd.xlane.f32.xlu2 %v1059_v1  ;;  %v715_v47 = vsel %vm512_vm1, %v1847_v41, 0.0 }
 0x471   : > { %v1849_v46 = vpop.eup %1848 }
 0x472   : > { %v1062_v39 = vsel %vm512_vm1, %v1849_v46, 0.0 }
 0x473   : > { %1063 = vadd.xlane.f32.xlu1 %v1062_v39  ;;  %716 = vadd.xlane.f32.xlu2 %v715_v47 }
 0x479   : > { %v1825_v40 = vpop.permute.xlu0 %1824 }
 0x47a   : > { %v1826_v49 = vunpack.i.l.bf16 %v1825_v40  ;;  %v1827_v53 = vunpack.i.h.bf16 %v1825_v40 }
 0x47c   : > { %1105 = vmatpush.msra.mxu1 %v1826_v49 }
 0x47e   : > { %1106 = vmatpush.msra.mxu1 %v1827_v53 }
 0x4de   : > { %v1061_v62 = vpop.xlane.xlu2 %1060 }
 0x4df   : > { %1850 = vrcp.f32 %v1061_v62 }
 0x4e5   : > { %v1851_v2 = vpop.eup %1850 }
 0x4e6   : > { %v2423_v5 = vmul.f32 %v1851_v2, %v1845_v30  ;;  %v717_v6 = vpop.xlane.xlu2 %716  ;;  %v1064_v7 = vpop.xlane.xlu1 %1063 }
 0x4e7   : > { %1852 = vrcp.f32 %v717_v6 }
 0x4e8   : > { %1854 = vrcp.f32 %v1064_v7  ;;  %1663 = vmatmul.msk.f32.vlgmr.msra.gmra.mxu1 %vm512_vm1, %v2423_v5  ;;  %v1114_v59 = vsel %vm591_vm13, %v2423_v5, 0.0  ;;  %v1069_v24 = vsel %vm575_vm12, %v2423_v5, 0.0  ;;  %v1126_v10 = vsel %vm605_vm14, %v2423_v5, 0.0 }
 0x4e9   : > { %v1116_v60 = vsel %vm512_vm1, %v1114_v59, 0.0  ;;  %v1071_v63 = vsel %vm512_vm1, %v1069_v24, 0.0  ;;  %v1128_v30 = vsel %vm512_vm1, %v1126_v10, 0.0  ;;  %v1150_v1 = vsel %vm633_vm0, %v2423_v5, 0.0 }
 0x4ea   : > { %v1162_v47 = vsel %vm647_vm2, %v2423_v5, 0.0 }
 0x4eb   : > { %v1164_v49 = vsel %vm512_vm1, %v1162_v47, 0.0 }
 0x4ed   : > { %v1853_v0 = vpop.eup %1852 }
 0x4ee   : > { %v1855_v4 = vpop.eup %1854  ;;  %v723_v43 = vmul.f32 %v1853_v0, %v1847_v41  ;;  %v1138_v0 = vsel %vm619_vm15, %v2423_v5, 0.0 }
 0x4ef   : > { %v2427_v36 = vmul.f32 %v1855_v4, %v1849_v46  ;;  %v1152_v46 = vsel %vm512_vm1, %v1150_v1, 0.0  ;;  %v1186_v4 = vsel %vm675_vm10, %v2423_v5, 0.0 }
 0x4f0   : > { %1653 = vmatmul.msk.f32.vlgmr.msrb.gmra.mxu2 %vm512_vm1, %v723_v43  ;;  %v784_v27 = vsel %vm605_vm14, %v723_v43, 0.0  ;;  %v771_v8 = vsel %vm591_vm13, %v723_v43, 0.0  ;;  %v725_v9 = vsel %vm575_vm12, %v723_v43, 0.0  ;;  %v810_v54 = vsel %vm633_vm0, %v723_v43, 0.0 }
 0x4f1   : > { %1664 = vmatmul.msk.f32.gmra.mxu1 %vm512_vm1, %v2427_v36  ;;  %v786_v28 = vsel %vm512_vm1, %v784_v27, 0.0  ;;  %v773_v58 = vsel %vm512_vm1, %v771_v8, 0.0  ;;  %v727_v12 = vsel %vm512_vm1, %v725_v9, 0.0  ;;  %v797_v35 = vsel %vm619_vm15, %v723_v43, 0.0 }
 0x4f2   : > { %787 = vadd.xlane.f32.xlu2 %v786_v28  ;;  %774 = vadd.xlane.f32.xlu1 %v773_v58  ;;  %v812_v45 = vsel %vm512_vm1, %v810_v54, 0.0  ;;  %v799_v37 = vsel %vm512_vm1, %v797_v35, 0.0  ;;  %v823_v13 = vsel %vm647_vm2, %v723_v43, 0.0  ;;  %v849_v48 = vsel %vm675_vm10, %v723_v43, 0.0 }
 0x4f3   : > { %728 = vadd.xlane.f32.xlu0 %v727_v12  ;;  %v825_v55 = vsel %vm512_vm1, %v823_v13, 0.0  ;;  %v836_v16 = vsel %vm2785_vm7, %v723_v43, 0.0  ;;  %v851_v17 = vsel %vm512_vm1, %v849_v48, 0.0  ;;  %v862_v56 = vsel %vm2786_vm9, %v723_v43, 0.0 }
 0x4f4   : > { %v838_v18 = vsel %vm512_vm1, %v836_v16, 0.0  ;;  %v864_v19 = vsel %vm512_vm1, %v862_v56, 0.0  ;;  %v1070_v25 = vsel %vm576_vm3, %v2427_v36, 0.0  ;;  %v1115_v11 = vsel %vm592_vm4, %v2427_v36, 0.0  ;;  %vm2788_vm3 = vmmov %vm2785_vm7 }
 0x4f5   : > { %v1074_v29 = vsel %vm512_vm1, %v1070_v25, 0.0  ;;  %v1119_v32 = vsel %vm512_vm1, %v1115_v11, 0.0  ;;  %v1127_v41 = vsel %vm606_vm5, %v2427_v36, 0.0  ;;  %v1139_v40 = vsel %vm620_vm6, %v2427_v36, 0.0  ;;  %vm2789_vm4 = vmmov %vm2787_vm11 }
 0x4f6   : > { %v1131_v39 = vsel %vm512_vm1, %v1127_v41, 0.0  ;;  %v1143_v53 = vsel %vm512_vm1, %v1139_v40, 0.0  ;;  %v1174_v62 = vsel %vm2788_vm3, %v2423_v5, 0.0  ;;  %v1151_v2 = vsel %vm2789_vm4, %v2427_v36, 0.0  ;;  %vm2791_vm5 = vmmov %vm2786_vm9 }
 0x4f7   : > { %v1176_v6 = vsel %vm512_vm1, %v1174_v62, 0.0  ;;  %v1155_v7 = vsel %vm512_vm1, %v1151_v2, 0.0  ;;  %v1163_v43 = vsel %vm648_vm8, %v2427_v36, 0.0  ;;  %v1140_v27 = vsel %vm512_vm1, %v1138_v0, 0.0 }
 0x4f8   : > { %v1188_v8 = vsel %vm512_vm1, %v1186_v4, 0.0  ;;  %v1167_v9 = vsel %vm512_vm1, %v1163_v43, 0.0  ;;  %vm2790_vm2 = vcmp.eq.s32.totalorder %v2203_v52, 2  ;;  %v1198_v58 = vsel %vm2791_vm5, %v2423_v5, 0.0 }
 0x4f9   : > { %v1175_v28 = vsel %vm2790_vm2, %v2427_v36, 0.0  ;;  %vm2792_vm6 = vcmp.eq.s32.totalorder %v2203_v52, 4  ;;  %v1200_v34 = vsel %vm512_vm1, %v1198_v58, 0.0  ;;  %vm2793_vm8 = vcmp.eq.s32.totalorder %v2203_v52, 3  ;;  %vm2794_vm10 = vmmov %vm2790_vm2 }
 0x4fa   : > { %813 = vadd.xlane.f32.xlu2 %v812_v45  ;;  %731 = vadd.xlane.f32.xlu1 %v730_v50  ;;  %v1199_v12 = vsel %vm2792_vm6, %v2427_v36, 0.0  ;;  %v1179_v54 = vsel %vm512_vm1, %v1175_v28, 0.0  ;;  %v1187_v45 = vsel %vm2793_vm8, %v2427_v36, 0.0  ;;  %v837_v5 = vsel %vm2794_vm10, %v2299_v38, 0.0  ;;  %v445_v50 = vld [vmem:[%s2134_s29 + $0x10] sm:$0xff]  ;;  %vm2795_vm12 = vmmov %vm2793_vm8 }
 0x4fb   : > { %800 = vadd.xlane.f32.xlu0 %v799_v37  ;;  %v1203_v35 = vsel %vm512_vm1, %v1199_v12, 0.0  ;;  %v1191_v3 = vsel %vm512_vm1, %v1187_v45, 0.0  ;;  %v841_v37 = vsel %vm512_vm1, %v837_v5, 0.0  ;;  %v2563_v51 = vperm.slane %v445_v50, 2  ;;  %vm2796_vm13 = vmmov %vm2792_vm6 }
 0x4fc   : > { %v2565_v13 = vperm.slane %v445_v50, 0  ;;  %v2567_v14 = vperm.slane %v445_v50, 1  ;;  %v850_v48 = vsel %vm2795_vm12, %v2299_v38, 0.0  ;;  %vm2797_vm14 = vcmask 261120  }
 0x4fd   : > { %vm2798_vm15 = vmmov %vm2797_vm14 }
 0x4fe   : > { %vm2799_vm0 = vmmov %vm2797_vm14 }
 0x4ff   : > { %vm2800_vm7 = vmmov %vm2799_vm0 }
 0x500   : > { %vm2801_vm9 = vmmov %vm2799_vm0 }
 0x501   : > { %vm2802_vm11 = vmmov %vm2799_vm0 }
 0x502   : > { %790 = vadd.xlane.f32.xlu2 %v789_v33  ;;  %826 = vadd.xlane.f32.xlu1 %v825_v55  ;;  %vm2803_vm10 = vmmov %vm2799_vm0 }
 0x503   : > { %777 = vadd.xlane.f32.xlu0 %v776_v15  ;;  %vm2804_vm12 = vmmov %vm2799_vm0 }
 0x50a   : > { %852 = vadd.xlane.f32.xlu2 %v851_v17  ;;  %803 = vadd.xlane.f32.xlu1 %v802_v57  ;;  %v854_v17 = vsel %vm512_vm1, %v850_v48, 0.0 }
 0x50b   : > { %839 = vadd.xlane.f32.xlu0 %v838_v18 }
 0x512   : > { %865 = vadd.xlane.f32.xlu2 %v864_v19  ;;  %816 = vadd.xlane.f32.xlu1 %v815_v20  ;;  %v2577_v20 = vperm.slane %v445_v50, 3 }
 0x51a   : > { %1117 = vadd.xlane.f32.xlu2 %v1116_v60  ;;  %829 = vadd.xlane.f32.xlu1 %v828_v22  ;;  %v2579_v60 = vperm.slane %v445_v50, 4 }
 0x51f   : > { %1829 = vrot.lane.b32.xlu0 %v1828_v23, %s1982_s18 }
 0x522   : > { %1072 = vadd.xlane.f32.xlu1 %v1071_v63  ;;  %1075 = vadd.xlane.f32.xlu2 %v1074_v29 }
 0x52a   : > { %1129 = vadd.xlane.f32.xlu1 %v1128_v30  ;;  %1120 = vadd.xlane.f32.xlu2 %v1119_v32  ;;  %v2585_v30 = vperm.slane %v445_v50, 5 }
 0x532   : > { %1153 = vadd.xlane.f32.xlu1 %v1152_v46  ;;  %1132 = vadd.xlane.f32.xlu2 %v1131_v39  ;;  %v2588_v46 = vperm.slane %v445_v50, 6 }
 0x53a   : > { %1165 = vadd.xlane.f32.xlu1 %v1164_v49  ;;  %1144 = vadd.xlane.f32.xlu2 %v1143_v53 }
 0x542   : > { %1177 = vadd.xlane.f32.xlu1 %v1176_v6  ;;  %1156 = vadd.xlane.f32.xlu2 %v1155_v7 }
 0x549   : > { %1141 = vadd.xlane.f32.xlu0 %v1140_v27  ;;  %v2597_v27 = vld [vmem:[%s2134_s29 + $0x18] ss:$0 sm:$0xff] }
 0x54a   : > { %1189 = vadd.xlane.f32.xlu1 %v1188_v8  ;;  %1168 = vadd.xlane.f32.xlu2 %v1167_v9 }
 0x551   : > { %1180 = vadd.xlane.f32.xlu0 %v1179_v54 }
 0x552   : > { %1201 = vadd.xlane.f32.xlu1 %v1200_v34  ;;  %1204 = vadd.xlane.f32.xlu2 %v1203_v35 }
 0x55a   : > { %1192 = vadd.xlane.f32.xlu1 %v1191_v3 }
 0x562   : > { %842 = vadd.xlane.f32.xlu1 %v841_v37 }
 0x565   : > { %v788_v33 = vpop.xlane.xlu2 %787  ;;  %v775_v15 = vpop.xlane.xlu1 %774 }
 0x566   : > { %v793_v36 = vmul.f32 %v2563_v51, %v788_v33  ;;  %v729_v55 = vpop.xlane.xlu0 %728  ;;  %v780_v16 = vmul.f32 %v2567_v14, %v775_v15 }
 0x567   : > { %v734_v31 = vmul.f32 %v2565_v13, %v729_v55 }
 0x56a   : > { %855 = vadd.xlane.f32.xlu1 %v854_v17 }
 0x56d   : > { %v814_v57 = vpop.xlane.xlu2 %813  ;;  %v732_v56 = vpop.xlane.xlu1 %731 }
 0x56e   : > { %v801_v18 = vpop.xlane.xlu0 %800  ;;  %v735_v61 = vmul.f32 %v2565_v13, %v732_v56  ;;  %v819_v1 = vmul.f32 %v2579_v60, %v814_v57  ;;  %v1108_v56 = vpop.f32.mrf.mxu1 }
 0x56f   : > { %v806_v10 = vmul.f32 %v2577_v20, %v801_v18 }
 0x570   : > { %v769_v25 = vadd.f32 %v2361_v42, %v735_v61  ;;  %v2591_v42 = vperm.slane %v445_v50, 7 }
 0x573   : > { %v765_v19 = vpop.f32.mrf.mxu2 }
 0x574   : > { %v766_v59 = vadd.f32 %v765_v19, %v734_v31 }
 0x575   : > { %v791_v21 = vpop.xlane.xlu2 %790  ;;  %v827_v29 = vpop.xlane.xlu1 %826 }
 0x576   : > { %v782_v22 = vadd.f32 %v780_v16, %v766_v59  ;;  %v794_v23 = vmul.f32 %v2563_v51, %v791_v21  ;;  %v778_v24 = vpop.xlane.xlu0 %777  ;;  %v832_v40 = vmul.f32 %v2585_v30, %v827_v29 }
 0x577   : > { %v781_v63 = vmul.f32 %v2567_v14, %v778_v24 }
 0x578   : > { %v795_v11 = vadd.f32 %v793_v36, %v782_v22 }
 0x579   : > { %v783_v32 = vadd.f32 %v781_v63, %v769_v25 }
 0x57a   : > { %v808_v41 = vadd.f32 %v806_v10, %v795_v11 }
 0x57b   : > { %v796_v39 = vadd.f32 %v794_v23, %v783_v32 }
 0x57c   : > { %v821_v47 = vadd.f32 %v819_v1, %v808_v41 }
 0x57d   : > { %v853_v49 = vpop.xlane.xlu2 %852  ;;  %v804_v6 = vpop.xlane.xlu1 %803 }
 0x57e   : > { %v834_v53 = vadd.f32 %v832_v40, %v821_v47  ;;  %v840_v62 = vpop.xlane.xlu0 %839  ;;  %v807_v7 = vmul.f32 %v2577_v20, %v804_v6  ;;  %v858_v0 = vmul.f32 %v2591_v42, %v853_v49  ;;  %v1866_v47 = vld [vmem:[%s2119_s23 + $0x10] sm:$0xff]  ;;  %v1867_v40 = vld [vmem:[%s2119_s23] sm:$0xff] }
 0x57f   : > { %v845_v2 = vmul.f32 %v2588_v46, %v840_v62  ;;  %v1833_v49 = vpack.i.bf16 %v1867_v40, %v1866_v47  ;;  %v1984_v47 = vmov 32.0  }
 0x580   : > { %v809_v43 = vadd.f32 %v807_v7, %v796_v39  ;;  %1856 = vrcp.f32 %v1984_v47 }
 0x581   : > { %v847_v4 = vadd.f32 %v845_v2, %v834_v53  ;;  %v1111_v53 = vpop.f32.mrf.mxu1  ;;  %1834 = vrot.lane.b32.xlu2 %v1833_v49, %s1982_s18 }
 0x583   : > { %v860_v8 = vadd.f32 %v858_v0, %v847_v4 }
 0x585   : > { %v866_v9 = vpop.xlane.xlu2 %865  ;;  %v817_v58 = vpop.xlane.xlu1 %816 }
 0x586   : > { %v871_v28 = vmul.f32 %v2597_v27, %v866_v9  ;;  %v820_v54 = vmul.f32 %v2579_v60, %v817_v58  ;;  %v1857_v40 = vpop.eup %1856 }
 0x587   : > { %v1275_v49 = vmul.f32 32.0, %v1857_v40 }
 0x588   : > { %v2600_v12 = vadd.f32 %v871_v28, %v860_v8  ;;  %v822_v34 = vadd.f32 %v820_v54, %v809_v43 }
 0x58d   : > { %v1118_v35 = vpop.xlane.xlu2 %1117  ;;  %v830_v45 = vpop.xlane.xlu1 %829 }
 0x58e   : > { %v833_v3 = vmul.f32 %v2585_v30, %v830_v45  ;;  %v1122_v59 = vmul.f32 %v1118_v35, %v2567_v14 }
 0x590   : > { %v2604_v50 = vadd.f32 %v833_v3, %v822_v34 }
 0x591   : > { %v1830_v5 = vpop.permute.xlu0 %1829 }
 0x592   : > { %v1831_v37 = vunpack.i.l.bf16 %v1830_v5  ;;  %v1832_v33 = vunpack.i.h.bf16 %v1830_v5 }
 0x594   : > { %1255 = vmatpush.msra.mxu2 %v1831_v37 }
 0x595   : > { %v1076_v36 = vpop.xlane.xlu2 %1075  ;;  %v1073_v55 = vpop.xlane.xlu1 %1072 }
 0x596   : > { %1256 = vmatpush.msra.mxu2 %v1832_v33  ;;  %v1077_v18 = vmul.f32 %v1073_v55, %v2565_v13  ;;  %v1078_v32 = vmul.f32 %v1076_v36, %v2565_v13 }
 0x598   : > { %v1109_v61 = vadd.f32 %v1108_v56, %v1077_v18  ;;  %v1112_v6 = vadd.f32 %v1111_v53, %v1078_v32  ;;  %v1276_v53 = vsub.f32 1.0, %v1275_v49 }
 0x59a   : > { %v1124_v22 = vadd.f32 %v1122_v59, %v1109_v61 }
 0x59d   : > { %v1121_v15 = vpop.xlane.xlu2 %1120  ;;  %v1130_v48 = vpop.xlane.xlu1 %1129 }
 0x59e   : > { %v1134_v21 = vmul.f32 %v1130_v48, %v2563_v51  ;;  %v1123_v39 = vmul.f32 %v1121_v15, %v2567_v14 }
 0x5a0   : > { %v1136_v25 = vadd.f32 %v1134_v21, %v1124_v22  ;;  %v1125_v43 = vadd.f32 %v1123_v39, %v1112_v6 }
 0x5a5   : > { %v1133_v31 = vpop.xlane.xlu2 %1132  ;;  %v1154_v16 = vpop.xlane.xlu1 %1153 }
 0x5a6   : > { %v1158_v29 = vmul.f32 %v1154_v16, %v2579_v60  ;;  %v1135_v7 = vmul.f32 %v1133_v31, %v2563_v51 }
 0x5a8   : > { %v1137_v28 = vadd.f32 %v1135_v7, %v1125_v43 }
 0x5ad   : > { %v1166_v17 = vpop.xlane.xlu1 %1165  ;;  %v1145_v57 = vpop.xlane.xlu2 %1144 }
 0x5ae   : > { %v1170_v1 = vmul.f32 %v1166_v17, %v2585_v30  ;;  %v1147_v8 = vmul.f32 %v1145_v57, %v2577_v20 }
 0x5b0   : > { %v1149_v35 = vadd.f32 %v1147_v8, %v1137_v28 }
 0x5b5   : > { %v1178_v19 = vpop.xlane.xlu1 %1177  ;;  %v1157_v23 = vpop.xlane.xlu2 %1156 }
 0x5b6   : > { %v1182_v62 = vmul.f32 %v1178_v19, %v2588_v46  ;;  %v1159_v58 = vmul.f32 %v1157_v23, %v2579_v60 }
 0x5b8   : > { %v1161_v3 = vadd.f32 %v1159_v58, %v1149_v35 }
 0x5bc   : > { %v1142_v24 = vpop.xlane.xlu0 %1141 }
 0x5bd   : > { %v1146_v63 = vmul.f32 %v1142_v24, %v2577_v20  ;;  %v1190_v11 = vpop.xlane.xlu1 %1189  ;;  %v1169_v0 = vpop.xlane.xlu2 %1168 }
 0x5be   : > { %v1194_v13 = vmul.f32 %v1190_v11, %v2591_v42  ;;  %v1171_v51 = vmul.f32 %v1169_v0, %v2585_v30  ;;  %v863_v30 = vsel %vm2796_vm13, %v2299_v38, 0.0  ;;  %v1869_v11 = vld [vmem:[#allocation2] sm:$0xff]  ;;  %vm1370_vm13 = vcmask 523264  }
 0x5bf   : > { %v1148_v10 = vadd.f32 %v1146_v63, %v1136_v25  ;;  %v867_v31 = vsel %vm512_vm1, %v863_v30, 0.0 }
 0x5c0   : > { %v1173_v37 = vadd.f32 %v1171_v51, %v1161_v3  ;;  %v433_v3 = vld [vmem:[%s2119_s23 + $0x38] sm:$0xff] }
 0x5c1   : > { %v1160_v41 = vadd.f32 %v1158_v29, %v1148_v10  ;;  %1355 = vmatpush.msra.mxu3 %v433_v3 }
 0x5c3   : > { %v1172_v2 = vadd.f32 %v1170_v1, %v1160_v41 }
 0x5c4   : > { %v1181_v34 = vpop.xlane.xlu0 %1180 }
 0x5c5   : > { %v1184_v4 = vadd.f32 %v1182_v62, %v1172_v2  ;;  %v1202_v9 = vpop.xlane.xlu1 %1201  ;;  %v1183_v5 = vmul.f32 %v1181_v34, %v2588_v46  ;;  %v1205_v33 = vpop.xlane.xlu2 %1204  ;;  %v1277_v62 = vmul.f32 %v1857_v40, %v1276_v53 }
 0x5c6   : > { %v1206_v54 = vmul.f32 %v2597_v27, %v1202_v9  ;;  %v1207_v60 = vmul.f32 %v2597_v27, %v1205_v33 }
 0x5c7   : > { %v1196_v14 = vadd.f32 %v1194_v13, %v1184_v4  ;;  %v1185_v36 = vadd.f32 %v1183_v5, %v1173_v37  ;;  %v1278_v2 = vadd.f32 %v1857_v40, %v1277_v62  ;;  %v431_v5 = vld [vmem:[%s2119_s23 + $0x28] sm:$0xff]  ;;  %v429_v37 = vld [vmem:[%s2119_s23 + $0x18] sm:$0xff] }
 0x5c8   : > { %1356 = vmatpush.msra.mxu3 %v431_v5 }
 0x5c9   : > { %v1208_v45 = vadd.f32 %v1206_v54, %v1196_v14 }
 0x5ca   : > { %1357 = vmatpush.msra.mxu3 %v429_v37 }
 0x5cb   : > { %1212 = vrot.lane.b32.xlu0 %v1208_v45, %s1983_s19 }
 0x5cd   : > { %v1193_v20 = vpop.xlane.xlu1 %1192 }
 0x5ce   : > { %v1195_v55 = vmul.f32 %v1193_v20, %v2591_v42 }
 0x5d0   : > { %v1197_v15 = vadd.f32 %v1195_v55, %v1185_v36  ;;  %v427_v36 = vld [vmem:[%s2119_s23 + $0x8] sm:$0xff] }
 0x5d1   : > { %1358 = vmatpush.msra.mxu3 %v427_v36 }
 0x5d2   : > { %v1209_v48 = vadd.f32 %v1207_v60, %v1197_v15  ;;  %v441_v15 = vld [vmem:[%s2124_s15 + $0x38] sm:$0xff] }
 0x5d3   : > { %1385 = vmatpush.msra.mxu0 %v441_v15 }
 0x5d4   : > { %1214 = vrot.lane.b32.xlu1 %v1209_v48, %s1983_s19  ;;  %v440_v48 = vld [vmem:[%s2124_s15 + $0x30] sm:$0xff] }
 0x5d5   : > { %v843_v61 = vpop.xlane.xlu1 %842  ;;  %1386 = vmatpush.msra.mxu0 %v440_v48 }
 0x5d6   : > { %v846_v52 = vmul.f32 %v2588_v46, %v843_v61 }
 0x5d8   : > { %v848_v59 = vadd.f32 %v846_v52, %v2604_v50 }
 0x5db   : > { %v1835_v16 = vpop.permute.xlu2 %1834 }
 0x5dc   : > { %v1837_v17 = vunpack.i.h.bf16 %v1835_v16  ;;  %v1836_v57 = vunpack.i.l.bf16 %v1835_v16 }
 0x5dd   : > { %v856_v19 = vpop.xlane.xlu1 %855 }
 0x5de   : > { %1257 = vmatpush.msra.mxu2 %v1836_v57  ;;  %v859_v38 = vmul.f32 %v2591_v42, %v856_v19  ;;  %v438_v57 = vld [vmem:[%s2124_s15 + $0x20] sm:$0xff] }
 0x5e0   : > { %1258 = vmatpush.msra.mxu2 %v1837_v17  ;;  %v861_v22 = vadd.f32 %v859_v38, %v848_v59 }
 0x5f5   : > { %868 = vadd.xlane.f32.xlu0 %v867_v31  ;;  %v439_v31 = vld [vmem:[%s2124_s15 + $0x28] sm:$0xff] }
 0x5f6   : > { %1387 = vmatpush.msra.mxu0 %v439_v31 }
 0x5f8   : > { %1388 = vmatpush.msra.mxu0 %v438_v57 }
 0x63d   : > { %v1213_v18 = vpop.permute.xlu0 %1212 }
 0x63e   : > { %v1218_v56 = vsel %vm512_vm1, %v2600_v12, %v1213_v18  ;;  %v2641_v12 = vld [vmem:[%s2129_s11] sm:$0xf]  ;;  %v437_v18 = vld [vmem:[%s2124_s15 + $0x18] sm:$0xff] }
 0x63f   : > { %1665 = vmatmul.msk.f32.vlgmr.msra.gmra.mxu2 %vm2797_vm14, %v1218_v56  ;;  %v1220_v29 = vperm.slane %v2641_v12, 1  ;;  %v2652_v8 = vperm.slane %v2641_v12, 2  ;;  %1389 = vmatpush.msra.mxu0 %v437_v18  ;;  %vm2805_vm14 = vmmov %vm2799_vm0 }
 0x646   : > { %v1215_v25 = vpop.permute.xlu1 %1214 }
 0x668   : > { %v869_v21 = vpop.xlane.xlu0 %868 }
 0x669   : > { %v872_v23 = vmul.f32 %v2597_v27, %v869_v21  ;;  %v1870_v27 = vld [vmem:[#allocation2 + $0x8] sm:$0xff] }
 0x66b   : > { %v874_v24 = vadd.f32 %v872_v23, %v861_v22 }
 0x66d   : > { %v1219_v63 = vsel %vm512_vm1, %v874_v24, %v1215_v25  ;;  %vm1279_vm1 = vweird.f32 %v1857_v40 }
 0x66e   : > { %1666 = vmatmul.msk.f32.gmra.mxu2 %vm2798_vm15, %v1219_v63  ;;  %v2647_v6 = vsel %vm1279_vm1, %v1857_v40, %v1278_v2  ;;  %vm2806_vm15 = vmmov %vm2799_vm0 }
 0x6c2   : > { %v1260_v10 = vpop.f32.mrf.mxu2 }
 0x6c3   : > { %v1261_v46 = vadd.f32 %v1260_v10, %v1220_v29 }
 0x6c5   : > { %v1266_v42 = vadd.f32 %v1869_v11, %v1261_v46 }
 0x6c7   : > { %v1268_v50 = vsel %vm2799_vm0, %v1266_v42, 0.0 }
 0x6c8   : > { %1269 = vadd.xlane.f32.xlu2 %v1268_v50 }
 0x6e0   : > { %1321 = vrot.lane.b32.xlu2 %v2652_v8, %s1968_s0 }
 0x6f1   : > { %v1263_v32 = vpop.f32.mrf.mxu2 }
 0x6f2   : > { %v1264_v1 = vadd.f32 %v1263_v32, %v1220_v29 }
 0x6f4   : > { %v1267_v41 = vadd.f32 %v1870_v27, %v1264_v1  ;;  %v436_v1 = vld [vmem:[%s2124_s15 + $0x10] sm:$0xff]  ;;  %v435_v27 = vld [vmem:[%s2124_s15 + $0x8] sm:$0xff] }
 0x6f5   : > { %1390 = vmatpush.msra.mxu0 %v436_v1 }
 0x6f6   : > { %v1271_v39 = vsel %vm2800_vm7, %v1267_v41, 0.0  ;;  %vm2807_vm7 = vmmov %vm2799_vm0 }
 0x6f7   : > { %1272 = vadd.xlane.f32.xlu1 %v1271_v39  ;;  %1391 = vmatpush.msra.mxu0 %v435_v27 }
 0x710   : > { %1334 = vrot.lane.b32.xlu1 %v1220_v29, %s1968_s0 }
 0x73b   : > { %v1270_v7 = vpop.xlane.xlu2 %1269 }
 0x73c   : > { %v1281_v0 = vmul.f32 %v2647_v6, %v1270_v7 }
 0x73e   : > { %v1283_v4 = vsub.f32 %v1266_v42, %v1281_v0 }
 0x740   : > { %v1285_v13 = vmul.f32 %v1283_v4, %v1283_v4 }
 0x742   : > { %v1287_v43 = vsel %vm2801_vm9, %v1285_v13, 0.0 }
 0x743   : > { %1288 = vadd.xlane.f32.xlu0 %v1287_v43  ;;  %v1322_v21 = vpop.permute.xlu2 %1321 }
 0x76a   : > { %v1273_v14 = vpop.xlane.xlu1 %1272 }
 0x76b   : > { %v1282_v9 = vmul.f32 %v2647_v6, %v1273_v14 }
 0x76d   : > { %v1284_v28 = vsub.f32 %v1267_v41, %v1282_v9  ;;  %v434_v41 = vld [vmem:[%s2124_s15] sm:$0xff] }
 0x76e   : > { %1392 = vmatpush.msra.mxu0 %v434_v41 }
 0x76f   : > { %v1286_v58 = vmul.f32 %v1284_v28, %v1284_v28 }
 0x771   : > { %v1290_v54 = vsel %vm2802_vm11, %v1286_v58, 0.0 }
 0x772   : > { %1291 = vadd.xlane.f32.xlu0 %v1290_v54 }
 0x782   : > { %v1335_v39 = vpop.permute.xlu1 %1334 }
 0x786   : > { %1326 = vrot.lane.b32.xlu0 %v2652_v8, %s1979_s12 }
 0x7b6   : > { %v1289_v34 = vpop.xlane.xlu0 %1288 }
 0x7b7   : > { %v1293_v35 = vmul.f32 %v1289_v34, %v2647_v6 }
 0x7b9   : > { %v1295_v51 = vadd.f32 1e-05, %v1293_v35 }
 0x7bb   : > { %1858 = vrsqrt.f32 %v1295_v51  ;;  %vm1303_vm4 = vweird.f32 %v1295_v51 }
 0x7c1   : > { %v1859_v45 = vpop.eup %1858 }
 0x7c2   : > { %v1298_v33 = vmul.f32 %v1859_v45, %v1295_v51  ;;  %vm1304_vm3 = vweird.f32 %v1859_v45  ;;  %v1448_v51 = vperm.slane %v2641_v12, 3 }
 0x7c3   : > { %vm1305_vm2 = vmor %vm1303_vm4, %vm1304_vm3 }
 0x7c4   : > { %v1299_v20 = vmul.f32 %v1859_v45, %v1298_v33 }
 0x7c6   : > { %v1300_v55 = vmul.f32 0.5, %v1299_v20 }
 0x7c8   : > { %v1301_v16 = vsub.f32 1.5, %v1300_v55 }
 0x7ca   : > { %v1302_v56 = vmul.f32 %v1859_v45, %v1301_v16 }
 0x7cc   : > { %v1306_v19 = vsel %vm1305_vm2, %v1859_v45, %v1302_v56 }
 0x7cd   : > { %v1317_v38 = vmul.f32 %v1306_v19, %v1283_v4 }
 0x7cf   : > { %v1324_v23 = vmul.f32 %v1322_v21, %v1317_v38 }
 0x7e5   : > { %v1292_v60 = vpop.xlane.xlu0 %1291 }
 0x7e6   : > { %v1294_v30 = vmul.f32 %v1292_v60, %v2647_v6 }
 0x7e8   : > { %v1296_v17 = vadd.f32 1e-05, %v1294_v30 }
 0x7ea   : > { %1860 = vrsqrt.f32 %v1296_v17  ;;  %vm1313_vm6 = vweird.f32 %v1296_v17 }
 0x7f0   : > { %v1861_v61 = vpop.eup %1860 }
 0x7f1   : > { %v1308_v52 = vmul.f32 %v1861_v61, %v1296_v17  ;;  %vm1314_vm5 = vweird.f32 %v1861_v61 }
 0x7f2   : > { %vm1315_vm8 = vmor %vm1313_vm6, %vm1314_vm5 }
 0x7f3   : > { %v1309_v59 = vmul.f32 %v1861_v61, %v1308_v52  ;;  %vm2808_vm5 = vmmov %vm2799_vm0 }
 0x7f4   : > { %vm2809_vm6 = vmmov %vm2799_vm0 }
 0x7f5   : > { %v1310_v22 = vmul.f32 0.5, %v1309_v59 }
 0x7f7   : > { %v1311_v24 = vsub.f32 1.5, %v1310_v22 }
 0x7f8   : > { %v1327_v25 = vpop.permute.xlu0 %1326 }
 0x7f9   : > { %v1312_v63 = vmul.f32 %v1861_v61, %v1311_v24  ;;  %v1329_v29 = vadd.f32 %v1327_v25, %v1324_v23 }
 0x7fb   : > { %v1316_v10 = vsel %vm1315_vm8, %v1861_v61, %v1312_v63  ;;  %v1331_v46 = vmul.f32 %v1329_v29, %v2275_v26 }
 0x7fc   : > { %v1318_v11 = vmul.f32 %v1316_v10, %v1284_v28 }
 0x7fd   : > { %1667 = vmatmul.msk.f32.vlgmr.msra.gmra.mxu3 %vm2803_vm10, %v1331_v46 }
 0x7fe   : > { %v1325_v42 = vmul.f32 %v1322_v21, %v1318_v11 }
 0x800   : > { %v1330_v50 = vadd.f32 %v1327_v25, %v1325_v42 }
 0x802   : > { %v1332_v32 = vmul.f32 %v1330_v50, %v2190_v44 }
 0x805   : > { %1668 = vmatmul.msk.f32.gmra.mxu3 %vm2804_vm12, %v1332_v32 }
 0x880   : > { %v1360_v47 = vpop.f32.mrf.mxu3 }
 0x881   : > { %v1361_v40 = vadd.f32 %v1360_v47, %v1335_v39 }
 0x883   : > { %v1366_v49 = vmax.f32 %v1361_v40, 0.0 }
 0x885   : > { %v1368_v53 = vmul.f32 %v1366_v49, %v2275_v26 }
 0x887   : > { %1669 = vmatmul.msk.f32.vlgmr.msra.gmra.mxu0 %vm1370_vm13, %v1368_v53 }
 0x888   : > { %v1363_v62 = vpop.f32.mrf.mxu3 }
 0x889   : > { %v1364_v2 = vadd.f32 %v1363_v62, %v1335_v39 }
 0x88b   : > { %v1367_v7 = vmax.f32 %v1364_v2, 0.0 }
 0x88d   : > { %v1369_v0 = vmul.f32 %v1367_v7, %v2190_v44 }
 0x88f   : > { %1670 = vmatmul.msk.f32.gmra.mxu0 %vm1370_vm13, %v1369_v0 }
 0x904   : > { %v1394_v4 = vpop.f32.mrf.mxu0 }
 0x905   : > { %v1395_v13 = vadd.f32 %v1394_v4, %v2652_v8 }
 0x907   : > { %v1400_v43 = vmul.f32 %v1395_v13, %v2275_v26 }
 0x909   : > { %v1402_v14 = vadd.f32 %v1400_v43, %v1329_v29 }
 0x90b   : > { %v1404_v9 = vsel %vm2805_vm14, %v1402_v14, 0.0 }
 0x90c   : > { %v1397_v28 = vpop.f32.mrf.mxu0  ;;  %1405 = vadd.xlane.f32.xlu2 %v1404_v9 }
 0x90d   : > { %v1398_v58 = vadd.f32 %v1397_v28, %v2652_v8 }
 0x90f   : > { %v1401_v54 = vmul.f32 %v1398_v58, %v2190_v44 }
 0x911   : > { %v1403_v34 = vadd.f32 %v1401_v54, %v1330_v50 }
 0x913   : > { %v1407_v35 = vsel %vm2806_vm15, %v1403_v34, 0.0 }
 0x914   : > { %1408 = vadd.xlane.f32.xlu0 %v1407_v35 }
 0x928   : > { %1452 = vrot.lane.b32.xlu0 %v1448_v51, %s1968_s0 }
 0x97f   : > { %v1406_v45 = vpop.xlane.xlu2 %1405 }
 0x980   : > { %v1410_v3 = vmul.f32 %v1406_v45, %v2647_v6 }
 0x982   : > { %v1412_v5 = vsub.f32 %v1402_v14, %v1410_v3 }
 0x984   : > { %v1414_v37 = vmul.f32 %v1412_v5, %v1412_v5 }
 0x986   : > { %v1416_v33 = vsel %vm2799_vm0, %v1414_v37, 0.0 }
 0x987   : > { %v1409_v20 = vpop.xlane.xlu0 %1408  ;;  %1417 = vadd.xlane.f32.xlu1 %v1416_v33 }
 0x988   : > { %v1411_v8 = vmul.f32 %v1409_v20, %v2647_v6 }
 0x98a   : > { %v1413_v36 = vsub.f32 %v1403_v34, %v1411_v8 }
 0x98c   : > { %v1415_v55 = vmul.f32 %v1413_v36, %v1413_v36 }
 0x98e   : > { %v1419_v60 = vsel %vm2807_vm7, %v1415_v55, 0.0 }
 0x98f   : > { %1420 = vadd.xlane.f32.xlu2 %v1419_v60 }
 0x99a   : > { %v1453_v24 = vpop.permute.xlu0 %1452 }
 0x9fa   : > { %v1418_v15 = vpop.xlane.xlu1 %1417 }
 0x9fb   : > { %v1422_v12 = vmul.f32 %v1418_v15, %v2647_v6 }
 0x9fd   : > { %v1424_v48 = vadd.f32 1e-05, %v1422_v12 }
 0x9ff   : > { %1862 = vrsqrt.f32 %v1424_v48  ;;  %vm1432_vm9 = vweird.f32 %v1424_v48 }
 0xa02   : > { %v1421_v30 = vpop.xlane.xlu2 %1420 }
 0xa03   : > { %v1423_v31 = vmul.f32 %v1421_v30, %v2647_v6 }
 0xa05   : > { %v1863_v16 = vpop.eup %1862  ;;  %v1425_v17 = vadd.f32 1e-05, %v1423_v31 }
 0xa06   : > { %v1427_v57 = vmul.f32 %v1863_v16, %v1424_v48  ;;  %vm1433_vm1 = vweird.f32 %v1863_v16 }
 0xa07   : > { %1864 = vrsqrt.f32 %v1425_v17  ;;  %vm1434_vm11 = vmor %vm1432_vm9, %vm1433_vm1  ;;  %vm1442_vm4 = vweird.f32 %v1425_v17 }
 0xa08   : > { %v1428_v18 = vmul.f32 %v1863_v16, %v1427_v57 }
 0xa0a   : > { %v1429_v56 = vmul.f32 0.5, %v1428_v18 }
 0xa0c   : > { %v1430_v61 = vsub.f32 1.5, %v1429_v56 }
 0xa0d   : > { %v1865_v19 = vpop.eup %1864 }
 0xa0e   : > { %v1437_v52 = vmul.f32 %v1865_v19, %v1425_v17  ;;  %v1431_v38 = vmul.f32 %v1863_v16, %v1430_v61  ;;  %vm1443_vm3 = vweird.f32 %v1865_v19 }
 0xa0f   : > { %vm1444_vm2 = vmor %vm1442_vm4, %vm1443_vm3 }
 0xa10   : > { %v1438_v59 = vmul.f32 %v1865_v19, %v1437_v52  ;;  %v1435_v21 = vsel %vm1434_vm11, %v1863_v16, %v1431_v38 }
 0xa11   : > { %v1446_v22 = vmul.f32 %v1435_v21, %v1412_v5 }
 0xa12   : > { %v1439_v23 = vmul.f32 0.5, %v1438_v59 }
 0xa13   : > { %v1449_v25 = vmul.f32 %v1448_v51, %v1446_v22 }
 0xa14   : > { %v1440_v6 = vsub.f32 1.5, %v1439_v23 }
 0xa15   : > { %v1455_v63 = vadd.f32 %v1453_v24, %v1449_v25 }
 0xa16   : > { %v1441_v29 = vmul.f32 %v1865_v19, %v1440_v6 }
 0xa17   : > { %1457 = vst.msk [vmem:[#allocation2] sm:$0xff] %vm2808_vm5, %v1455_v63 }
 0xa18   : > { %v1445_v10 = vsel %vm1444_vm2, %v1865_v19, %v1441_v29 }
 0xa19   : > { %v1447_v46 = vmul.f32 %v1445_v10, %v1413_v36 }
 0xa1b   : > { %v1450_v11 = vmul.f32 %v1448_v51, %v1447_v46  ;;  %1462 = sbr.rel (%p1671_p1) target bundleno = 2596 (0xa24), region = 56 }
 0xa1d   : > { %v1456_v42 = vadd.f32 %v1453_v24, %v1450_v11 }
 0xa1f   : > { %1458 = vst.msk [vmem:[#allocation2 + $0x8] sm:$0xff] %vm2809_vm6, %v1456_v42 }
 0xa20   : > { %v1463_v50 = vmul.f32 %v1455_v63, %v2275_v26  ;;  %v1464_v32 = vmul.f32 %v1456_v42, %v2190_v44  ;;  %vm2810_vm8 = vcmask 261120  }
 0xa21   : > { %vm2811_vm10 = vmmov %vm2810_vm8 }
 0xa22   : > { %1465 = vst.msk [vmem:[%s2136_s1] sm:$0xff] %vm2810_vm8, %v1463_v50 }
 0xa23   : > { %1466 = vst.msk [vmem:[%s2136_s1 + $0x8] sm:$0xff] %vm2811_vm10, %v1464_v32 }
 0xa24 PF: > { %s1682_s21 = sshll.u32 %s1953_s28, 4  ;;  %s1480_s9 = sshll.u32 %s2136_s1, 4  ;;  %s1481_s9 = int_to_ptr.vmem [resolvable:$true] %s1480_s9 }
 0xa25   : > { %s1479_s27 = scalar_lea.hbm %s2755_s7, %s1682_s21  ;;  %s2812_s16 = sand.u32 1, %s1941_s25  }
 0xa26   : > { %s1482_s15 = sshll.u32 %s1479_s27, 4  ;;  %s1468_s30 = scalar_lea.sflag [#allocation4], %s2812_s16  ;;  %s1483_s15 = int_to_ptr.hbm [resolvable:$true] %s1482_s15 }
 0xa27   : > { %s1885_s11 = sshra.s32 %s1483_s15, 4  ;;  %s1891_s28 = scalar_lea.hbm %s2755_s7, 32  ;;  %s1886_s11 = int_to_ptr.hbm [resolvable:$true] %s1885_s11 }
 0xa28   : > { %s1887_s22 = scalar_lea.hbm %s1886_s11, 16  ;;  %p1892_p6 = scmp.lt.s32.totalorder %s1886_s11, %s2755_s7 }
 0xa29   : > { %p1888_p2 = scmp.ne.s32.totalorder %s1886_s11, %s1887_s22  ;;  %p1893_p7 = scmp.lt.s32.totalorder %s1891_s28, %s1887_s22 }
 0xa2b   : > { %p1889_p4 = pnand %p1888_p2, %p2076_p3  ;;  %p1894_p8 = por %p1893_p7, %p1892_p6 }
 0xa2d   : > { %p1890_p5 = pneg %p1889_p4 }
 0xa2f   : > { %p1895_p10 = pnand %p1894_p8, %p1890_p5 }
 0xa31   : > { %1898 = shalt.err (!%p1895_p10)
}
 0xa32   : > { %s1985_s1 = smov 128   ;;  %s1986_s12 = smov 8  }
 0xa33   : > { %1689 = dma.vmem_to_hbm [thread:$0]  (%p2076_p3), %s1481_s9, 256, %s1483_s15, %s1468_s30, %s1985_s1, %s1985_s1, %s1986_s12  }
 0xa34 PF: > { %p1695_p11 = scmp.ge.s32.totalorder %s1965_s8, 2  ;;  %s1497_s17 = sand.u32 1, %s1937_s24  }
 0xa35   : > { %s1498_s18 = scalar_lea.sflag [#allocation4], %s1497_s17 }
 0xa36   : > { %p1692_p12 = pnand %p1695_p11, %p2086_p9 }
 0xa38   : > { %p1693_p13 = pneg %p1692_p12 }
 0xa3a   : > { %1932 = dma.done.wait (%p1693_p13), %s1498_s18, 256  }
 0xa3b   : > { %1934 = vsyncadd (%p1693_p13), %s1498_s18, 4294967040  ;;  %s20_s8 = sadd.s32 1, %s1965_s8   ;;  %s2814_s19 = sld [smem:[#allocation6_spill]] }
 0xa3c   : > { %p17_p0 = scmp.ge.s32.totalorder %s20_s8, 6   ;;  %s2815_s26 = sld [smem:[#allocation12_spill]] }
 0xa3d   : > { %s2816_s27 = sld [smem:[#allocation7_spill]]  ;;  %s2820_s24 = smov %s1941_s25 }
 0xa3e   : > { %s2817_s28 = sld [smem:[#allocation8_spill]]  ;;  %19 = sbr.rel (!%p17_p0) target bundleno = 8 (0x8), region = 109 }
 0xa3f   : > { %s2818_s29 = sld [smem:[#allocation9_spill]] }
 0xa40   : > { %s2819_s30 = sld [smem:[#allocation10_spill]] }
 0xa41   : > { %s2821_s25 = smov %s2814_s19 }
 0xa43   :  { %1504 = vsyncpa [#allocation4], 1 }
 0xa44   :  { %1506 = vsyncpa [#allocation4 + $0x1], 1 }

</bundles_post_ra>
